<compile_context>
chip_gen: v7x
topology: tpu7x:2x2x1
jax: 0.10.0
libtpu: 0.0.40
codegen_flags: <defaults>
</compile_context>

<pallas_src>
import functools

import jax
import jax.numpy as jnp
from jax.experimental import pallas as pl
from jax.experimental.pallas import tpu as pltpu

_VMEM_LIMIT = 48 * 1024 * 1024   # safe on v5e/v6e (128 MiB) and v7x (64 MiB physical)


def _round_up(x, m):
    return (x + m - 1) // m * m


def _pick_tile(n, cap):
    """Largest power-of-two tile <= cap (>=128) that divides n (n is a multiple of 128)."""
    t = cap
    while t > 128 and n % t != 0:
        t //= 2
    return min(t, n)


def _row_tiling(n, bytes_per_row, cap=1024, budget=2 << 20):
    """Row tile for (rows, C)-style mem-bound kernels.

    Returns (rt, n_padded): rt is a multiple of 8 (or the full n), bounded by `cap`
    rows and by `budget` bytes per block; n_padded is a multiple of rt.
    """
    t = min(cap, max(8, budget // max(1, bytes_per_row)))
    t = max(8, t - t % 8)
    if n <= t:
        return n, n
    steps = -(-n // t)
    rt = _round_up(-(-n // steps), 8)
    return rt, rt * steps


# ----------------------------------------------------------------------------------
# Pallas kernels
# ----------------------------------------------------------------------------------

def _matmul_bias_act_kernel(x_ref, w_ref, b_ref, o_ref, acc_ref, *, act):
    @pl.when(pl.program_id(2) == 0)
    def _():
        acc_ref[...] = jnp.zeros_like(acc_ref)

    acc_ref[...] += jnp.dot(x_ref[...], w_ref[...], preferred_element_type=jnp.float32)

    @pl.when(pl.program_id(2) == pl.num_programs(2) - 1)
    def _():
        y = acc_ref[...] + b_ref[...]
        if act == "relu":
            y = jnp.maximum(y, 0.0)
        o_ref[...] = y.astype(o_ref.dtype)


def matmul_bias_act(x, wp, bp, act, n_out):
    """y = act(x @ wp + bp).  x:(M,K) bf16, wp:(Kp,Np) bf16 (BN scale folded, padded),
    bp:(1,Np) f32.  Returns (M, n_out) bf16."""
    M, K = x.shape
    Kp, Np = wp.shape
    tm = min(512, _round_up(M, 16))
    Mp = _round_up(M, tm)
    tk = _pick_tile(Kp, 1024)
    tn = _pick_tile(Np, 512)

    xp = x
    if (Mp, Kp) != (M, K):
        xp = jnp.pad(x, ((0, Mp - M), (0, Kp - K)))

    out = pl.pallas_call(
        functools.partial(_matmul_bias_act_kernel, act=act),
        out_shape=jax.ShapeDtypeStruct((Mp, Np), jnp.bfloat16),
        grid_spec=pltpu.PrefetchScalarGridSpec(
            num_scalar_prefetch=0,
            grid=(Mp // tm, Np // tn, Kp // tk),
            in_specs=[
                pl.BlockSpec((tm, tk), lambda i, j, k: (i, k)),
                pl.BlockSpec((tk, tn), lambda i, j, k: (k, j)),
                pl.BlockSpec((1, tn), lambda i, j, k: (0, j)),
            ],
            out_specs=pl.BlockSpec((tm, tn), lambda i, j, k: (i, j)),
            scratch_shapes=[pltpu.VMEM((tm, tn), jnp.float32)],
        ),
        compiler_params=pltpu.CompilerParams(
            dimension_semantics=("parallel", "parallel", "arbitrary"),
            vmem_limit_bytes=_VMEM_LIMIT),
    )(xp, wp, bp)
    if (Mp, Np) != (M, n_out):
        out = out[:M, :n_out]
    return out


def _grouped_conv_kernel(x_ref, w_ref, b_ref, o_ref):
    # x_ref: (1, tm, 9*128) bf16 tap-major patches of one 128-channel super-group
    # w_ref: (1, 9*128, 128) bf16 block-diagonal super-group weight (BN scale folded)
    # Single fused MXU matmul (K = 1152): accumulation stays in the MXU result path.
    y = jnp.dot(x_ref[0], w_ref[0], preferred_element_type=jnp.float32) + b_ref[...]
    o_ref[...] = jnp.maximum(y, 0.0).astype(o_ref.dtype)   # conv2 is always BN+ReLU


def _extract_patches_grouped(x, stride, gs):
    """NHWC -> (gs, B*Ho*Wo, 9*(C//gs)) 3x3/pad=1 patches, tap-major within a super-group."""
    # TODO(synk): build the 9 taps in-kernel from halo'd NHWC blocks to avoid the 9x
    # patch materialization through HBM.
    B, H, W, C = x.shape
    cg = C // gs
    Ho = (H + 2 - 3) // stride + 1
    Wo = (W + 2 - 3) // stride + 1
    xp = jnp.pad(x, ((0, 0), (1, 1), (1, 1), (0, 0)))
    taps = [xp[:, ky:ky + stride * Ho:stride, kx:kx + stride * Wo:stride, :]
              .reshape(B, Ho, Wo, gs, 1, cg)
            for ky in range(3) for kx in range(3)]
    p = jnp.concatenate(taps, axis=4)                    # (B, Ho, Wo, gs, 9, cg)
    p = jnp.moveaxis(p, 3, 0)                            # (gs, B, Ho, Wo, 9, cg)
    return p.reshape(gs, B * Ho * Wo, 9 * cg), Ho, Wo


def grouped_conv3x3(x, w_sg, bias, stride):
    """Grouped 3x3 conv (pad=1) + folded BN + ReLU via 128-lane super-group packing.
    x: (B,H,W,C) bf16; w_sg: (GS, 9*128, 128) bf16; bias: (1, C) f32."""
    B = x.shape[0]
    C = x.shape[3]
    GS, Kg = w_sg.shape[0], w_sg.shape[1]
    assert GS * 128 == C
    patches, Ho, Wo = _extract_patches_grouped(x, stride, GS)
    M = B * Ho * Wo
    tm = min(512, _round_up(M, 16))
    Mp = _round_up(M, tm)
    if Mp != M:
        patches = jnp.pad(patches, ((0, 0), (0, Mp - M), (0, 0)))

    out = pl.pallas_call(
        _grouped_conv_kernel,
        out_shape=jax.ShapeDtypeStruct((Mp, C), jnp.bfloat16),
        grid_spec=pltpu.PrefetchScalarGridSpec(
            num_scalar_prefetch=0,
            grid=(GS, Mp // tm),                        # M innermost -> weight stays resident
            in_specs=[
                pl.BlockSpec((1, tm, Kg), lambda s, i: (s, i, 0)),
                pl.BlockSpec((1, Kg, 128), lambda s, i: (s, 0, 0)),
                pl.BlockSpec((1, 128), lambda s, i: (0, s)),
            ],
            out_specs=pl.BlockSpec((tm, 128), lambda s, i: (i, s)),
        ),
        compiler_params=pltpu.CompilerParams(
            dimension_semantics=("parallel", "parallel"),
            vmem_limit_bytes=_VMEM_LIMIT),
    )(patches, w_sg, bias)
    if Mp != M:
        out = out[:M]
    return out.reshape(B, Ho, Wo, C)


def _se_gate_kernel(x_ref, w1_ref, b1_ref, w2_ref, b2_ref, o_ref, acc_ref, *, inv_hw):
    @pl.when(pl.program_id(0) == 0)
    def _():
        acc_ref[...] = jnp.zeros_like(acc_ref)

    acc_ref[...] += jnp.sum(x_ref[...].astype(jnp.float32), axis=1)          # (B, C)

    @pl.when(pl.program_id(0) == pl.num_programs(0) - 1)
    def _():
        pooled = acc_ref[...] * inv_hw                                       # (B, C) f32
        h = jnp.dot(pooled, w1_ref[...], preferred_element_type=jnp.float32) + b1_ref[...]
        h = jnp.maximum(h, 0.0)
        s = jnp.dot(h, w2_ref[...], preferred_element_type=jnp.float32) + b2_ref[...]
        o_ref[...] = jax.nn.sigmoid(s)


def se_gate(x, w1, b1, w2, b2):
    """Fused SE module: global-avg-pool + fc1(ReLU) + fc2(sigmoid), MLP in f32.
    Returns (B, C) f32 gates."""
    B, H, W, C = x.shape
    HW = H * W
    xf = x.reshape(B, HW, C)
    rt, HWp = _row_tiling(HW, bytes_per_row=B * C * 2)
    if HWp != HW:
        xf = jnp.pad(xf, ((0, 0), (0, HWp - HW), (0, 0)))        # zero pad: safe for sum
    return pl.pallas_call(
        functools.partial(_se_gate_kernel, inv_hw=1.0 / float(HW)),
        out_shape=jax.ShapeDtypeStruct((B, C), jnp.float32),
        grid_spec=pltpu.PrefetchScalarGridSpec(
            num_scalar_prefetch=0,
            grid=(HWp // rt,),
            in_specs=[
                pl.BlockSpec((B, rt, C), lambda r: (0, r, 0)),
                pl.BlockSpec(w1.shape, lambda r: (0, 0)),
                pl.BlockSpec(b1.shape, lambda r: (0, 0)),
                pl.BlockSpec(w2.shape, lambda r: (0, 0)),
                pl.BlockSpec(b2.shape, lambda r: (0, 0)),
            ],
            out_specs=pl.BlockSpec((B, C), lambda r: (0, 0)),
            scratch_shapes=[pltpu.VMEM((B, C), jnp.float32)],
        ),
        compiler_params=pltpu.CompilerParams(dimension_semantics=("arbitrary",)),
    )(xf, w1, b1, w2, b2)


def _se_res_kernel(x_ref, s_ref, r_ref, o_ref):
    y = x_ref[...].astype(jnp.float32) * s_ref[...] + r_ref[...].astype(jnp.float32)
    o_ref[...] = jnp.maximum(y, 0.0).astype(o_ref.dtype)


def se_residual_relu(x, s, residual):
    """relu(x * s[:,None,None,:] + residual), row-tiled."""
    B, H, W, C = x.shape
    HW = H * W
    xf = x.reshape(B, HW, C)
    rf = residual.reshape(B, HW, C)
    sf = s.reshape(B, 1, C)
    rt, HWp = _row_tiling(HW, bytes_per_row=3 * B * C * 2)
    if HWp != HW:
        pad = ((0, 0), (0, HWp - HW), (0, 0))
        xf = jnp.pad(xf, pad)
        rf = jnp.pad(rf, pad)
    out = pl.pallas_call(
        _se_res_kernel,
        out_shape=jax.ShapeDtypeStruct((B, HWp, C), jnp.bfloat16),
        grid_spec=pltpu.PrefetchScalarGridSpec(
            num_scalar_prefetch=0,
            grid=(HWp // rt,),
            in_specs=[
                pl.BlockSpec((B, rt, C), lambda r: (0, r, 0)),
                pl.BlockSpec((B, 1, C), lambda r: (0, 0, 0)),
                pl.BlockSpec((B, rt, C), lambda r: (0, r, 0)),
            ],
            out_specs=pl.BlockSpec((B, rt, C), lambda r: (0, r, 0)),
        ),
        compiler_params=pltpu.CompilerParams(dimension_semantics=("parallel",)),
    )(xf, sf, rf)
    if HWp != HW:
        out = out[:, :HW]
    return out.reshape(B, H, W, C)


def _max_reduce_kernel(x_ref, o_ref):
    o_ref[...] = jnp.max(x_ref[...], axis=0)


def _max_over_taps(stacked, rows, C):
    """Row-tiled max over the leading tap axis of a (k, rows, C) tensor."""
    k = stacked.shape[0]
    rt, rows_p = _row_tiling(rows, bytes_per_row=(k + 1) * C * 2)
    if rows_p != rows:
        stacked = jnp.pad(stacked, ((0, 0), (0, rows_p - rows), (0, 0)),
                          constant_values=-jnp.inf)
    out = pl.pallas_call(
        _max_reduce_kernel,
        out_shape=jax.ShapeDtypeStruct((rows_p, C), stacked.dtype),
        grid_spec=pltpu.PrefetchScalarGridSpec(
            num_scalar_prefetch=0,
            grid=(rows_p // rt,),
            in_specs=[pl.BlockSpec((k, rt, C), lambda r: (0, r, 0))],
            out_specs=pl.BlockSpec((rt, C), lambda r: (r, 0)),
        ),
        compiler_params=pltpu.CompilerParams(dimension_semantics=("parallel",)),
    )(stacked)
    return out[:rows] if rows_p != rows else out


def maxpool_ceil(x, k=3, s=2):
    """MaxPool2d(kernel=k, stride=s, ceil_mode=True) on NHWC x.
    Separable: 3-tap max over width, then 3-tap max over height (~3x less HBM traffic
    than stacking all 9 taps)."""
    B, H, W, C = x.shape
    Ho = -(-(H - k) // s) + 1
    Wo = -(-(W - k) // s) + 1
    Hp = s * (Ho - 1) + k
    Wp = s * (Wo - 1) + k
    xp = jnp.pad(x, ((0, 0), (0, Hp - H), (0, Wp - W), (0, 0)),
                 constant_values=-jnp.inf)
    w_taps = jnp.stack([xp[:, :, kx:kx + s * Wo:s, :] for kx in range(k)], axis=0)
    w_max = _max_over_taps(w_taps.reshape(k, B * Hp * Wo, C), B * Hp * Wo, C)
    w_max = w_max.reshape(B, Hp, Wo, C)
    h_taps = jnp.stack([w_max[:, ky:ky + s * Ho:s, :, :] for ky in range(k)], axis=0)
    out = _max_over_taps(h_taps.reshape(k, B * Ho * Wo, C), B * Ho * Wo, C)
    return out.reshape(B, Ho, Wo, C)


# ----------------------------------------------------------------------------------
# im2col glue + convolution wrappers
# ----------------------------------------------------------------------------------

def _extract_patches(x, kh, kw, stride, padding):
    """NHWC -> (B*Ho*Wo, kh*kw, C) patches, tap order t = ky*kw + kx."""
    B, H, W, C = x.shape
    Ho = (H + 2 * padding - kh) // stride + 1
    Wo = (W + 2 * padding - kw) // stride + 1
    xp = jnp.pad(x, ((0, 0), (padding, padding), (padding, padding), (0, 0)))
    taps = []
    for ky in range(kh):
        for kx in range(kw):
            taps.append(xp[:, ky:ky + stride * Ho:stride, kx:kx + stride * Wo:stride, :])
    patches = jnp.stack(taps, axis=3)                    # (B, Ho, Wo, T, C)
    return patches.reshape(B * Ho * Wo, kh * kw, C), Ho, Wo


def conv1x1_bn_act(x, wp, bp, act, n_out, stride=1):
    if stride > 1:
        x = x[:, ::stride, ::stride, :]
    B, H, W, C = x.shape
    y = matmul_bias_act(x.reshape(B * H * W, C), wp, bp, act, n_out)
    return y.reshape(B, H, W, n_out)


def stem_conv(x, wp, bp, n_out=64):
    """7x7 / stride 2 / pad 3 conv + folded BN + ReLU."""
    B = x.shape[0]
    cin = x.shape[3]
    patches, Ho, Wo = _extract_patches(x, 7, 7, 2, 3)     # (M, 49, cin)
    M = B * Ho * Wo
    xf = patches.reshape(M, 49 * cin)
    y = matmul_bias_act(xf, wp, bp, 'relu', n_out)
    return y.reshape(B, Ho, Wo, n_out)


# ----------------------------------------------------------------------------------
# Weight preparation (hoisted to init): BN fold, transpose, pad, bf16, group packing
# ----------------------------------------------------------------------------------

def _conv_w(key, cout, cin, kh, kw):
    fan_in = cin * kh * kw
    return jax.random.normal(key, (cout, cin, kh, kw), jnp.float32) / jnp.sqrt(float(fan_in))


def _bn_fold(key, c, eps=1e-5):
    k1, k2, k3, k4 = jax.random.split(key, 4)
    gamma = 1.0 + 0.1 * jax.random.normal(k1, (c,), jnp.float32)
    beta = 0.1 * jax.random.normal(k2, (c,), jnp.float32)
    mean = 0.1 * jax.random.normal(k3, (c,), jnp.float32)
    var = 1.0 + 0.1 * jax.random.uniform(k4, (c,), jnp.float32)
    scale = gamma / jnp.sqrt(var + eps)
    bias = beta - mean * scale
    return scale, bias


def _prep_conv_w(w, bn_scale, bn_bias):
    """(cout,cin,kh,kw) -> padded (Kp,Np) bf16 with BN scale folded in, bias (1,Np) f32."""
    cout, cin, kh, kw = w.shape
    wf = jnp.transpose(w, (2, 3, 1, 0)).reshape(kh * kw * cin, cout)   # K order = (t, ci)
    wf = wf * bn_scale[None, :]
    K, N = wf.shape
    Kp, Np = _round_up(K, 128), _round_up(N, 128)
    wp = jnp.zeros((Kp, Np), jnp.float32).at[:K, :N].set(wf).astype(jnp.bfloat16)
    bp = jnp.zeros((1, Np), jnp.float32).at[0, :N].set(bn_bias)
    return wp, bp


def _prep_grouped_w(w, bn_scale, groups):
    """Grouped 3x3 weight (cout, cin_g, kh, kw) -> (GS, 9*128, 128) super-group packing.

    Groups are packed into 128-lane super-groups (block-diagonal within one lane tile);
    K order = (tap, local lane) so the kernel can do one fused (tm, 9*128)x(9*128, 128)
    matmul per super-group.  Note: within a lane tile the weight is zero-padded dense,
    so padded FLOPs exceed the true grouped cost but never the dense-conv cost."""
    cout, cin_g, kh, kw = w.shape
    og = cout // groups
    assert og <= 128 and 128 % og == 0, og
    P = 128 // og
    assert groups % P == 0 and P * cin_g == 128
    GS = groups // P
    T = kh * kw
    w = w * bn_scale[:, None, None, None]
    w_g = w.reshape(GS, P, og, cin_g, kh, kw)                         # [s,p,j,ci,ky,kx]
    w_g = jnp.transpose(w_g, (0, 4, 5, 1, 3, 2)).reshape(GS, T, P, cin_g, og)
    eye = jnp.eye(P, dtype=w.dtype)
    w_bd = jnp.einsum('stpcj,pq->stpcqj', w_g, eye)                   # block-diagonal in (p,q)
    return w_bd.reshape(GS, T * P * cin_g, P * og).astype(jnp.bfloat16)


def _prep_fc_pair(w1, b1, w2, b2):
    """SE fc1/fc2 (1x1 convs with bias) -> f32 (C,midp), (1,midp), (midp,C), (1,C)."""
    mid, C = w1.shape[0], w1.shape[1]
    midp = _round_up(mid, 128)
    w1f = jnp.zeros((C, midp), jnp.float32).at[:, :mid].set(w1.reshape(mid, C).T)
    b1f = jnp.zeros((1, midp), jnp.float32).at[0, :mid].set(b1)
    w2f = jnp.zeros((midp, C), jnp.float32).at[:mid, :].set(w2.reshape(C, mid).T)
    b2f = b2.reshape(1, C).astype(jnp.float32)
    return w1f, b1f, w2f, b2f


def _make_block(key, inplanes, planes, groups, reduction, stride, downsample):
    # SEResNeXtBottleneck, base_width=4, expansion=4
    width = (planes * 4 // 64) * groups
    outc = planes * 4
    mid = outc // reduction
    ks = jax.random.split(key, 12)
    bn1 = _bn_fold(ks[1], width)
    bn2 = _bn_fold(ks[3], width)
    bn3 = _bn_fold(ks[5], outc)
    w1, b1 = _prep_conv_w(_conv_w(ks[0], width, inplanes, 1, 1), *bn1)
    w2 = _prep_grouped_w(_conv_w(ks[2], width, width // groups, 3, 3), bn2[0], groups)
    b2 = bn2[1].reshape(1, width).astype(jnp.float32)
    w3, b3 = _prep_conv_w(_conv_w(ks[4], outc, width, 1, 1), *bn3)
    fc1w, fc1b, fc2w, fc2b = _prep_fc_pair(
        _conv_w(ks[6], mid, outc, 1, 1),
        0.01 * jax.random.normal(ks[7], (mid,), jnp.float32),
        _conv_w(ks[8], outc, mid, 1, 1),
        0.01 * jax.random.normal(ks[9], (outc,), jnp.float32))
    params = dict(w1=w1, b1=b1, w2=w2, b2=b2, w3=w3, b3=b3,
                  fc1_w=fc1w, fc1_b=fc1b, fc2_w=fc2w, fc2_b=fc2b)
    cfg = dict(stride=stride, downsample=downsample, width=width, outc=outc)
    if downsample:
        bnd = _bn_fold(ks[11], outc)
        wd, bd = _prep_conv_w(_conv_w(ks[10], outc, inplanes, 1, 1), *bnd)
        params['wd'] = wd
        params['bd'] = bd
    return params, cfg


# ----------------------------------------------------------------------------------
# Forward pass
# ----------------------------------------------------------------------------------

def _bottleneck_forward(x, p, c):
    out = conv1x1_bn_act(x, p['w1'], p['b1'], 'relu', n_out=c['width'])
    out = grouped_conv3x3(out, p['w2'], p['b2'], c['stride'])                 # BN+ReLU fused
    out = conv1x1_bn_act(out, p['w3'], p['b3'], 'none', n_out=c['outc'])
    if c['downsample']:
        residual = conv1x1_bn_act(x, p['wd'], p['bd'], 'none',
                                  n_out=c['outc'], stride=c['stride'])
    else:
        residual = x
    s = se_gate(out, p['fc1_w'], p['fc1_b'], p['fc2_w'], p['fc2_b'])          # (B, C) f32
    return se_residual_relu(out, s, residual)


def _encoder_forward(cfg, params, x_nchw):
    x = jnp.transpose(x_nchw, (0, 2, 3, 1)).astype(jnp.bfloat16)   # NCHW -> NHWC, bf16
    x = jnp.concatenate([x, x, x], axis=-1)                        # torch.cat([img]*3, dim=1)
    x = stem_conv(x, params['stem_w'], params['stem_b'], 64)       # conv7x7/s2 + BN + ReLU
    x = maxpool_ceil(x, 3, 2)
    feats = []
    for lp, lc in zip(params['layers'], cfg['layers']):
        for bp, bc in zip(lp, lc):
            x = _bottleneck_forward(x, bp, bc)
        feats.append(jnp.transpose(x, (0, 3, 1, 2)).astype(jnp.float32))   # back to NCHW f32
    return tuple(feats)


class SeResNetXtEncoderPallas:
    """JAX/Pallas re-implementation of SeResNetXtEncoder.forward (inference)."""

    def __init__(self, layers, key):
        self.groups, self.reduction = 32, 16
        self.inplanes = 64
        k0, k1, k2, k3, k4 = jax.random.split(key, 5)
        kc, kb = jax.random.split(k0)
        stem_w, stem_b = _prep_conv_w(_conv_w(kc, 64, 3, 7, 7), *_bn_fold(kb, 64))
        p1, c1 = self._make_layer(k1, planes=64, blocks=layers[0], stride=1)
        p2, c2 = self._make_layer(k2, planes=128, blocks=layers[1], stride=2)
        p3, c3 = self._make_layer(k3, planes=256, blocks=layers[2], stride=2)
        p4, c4 = self._make_layer(k4, planes=512, blocks=layers[3], stride=2)
        self.params = {'stem_w': stem_w, 'stem_b': stem_b, 'layers': [p1, p2, p3, p4]}
        self.cfg = {'layers': [c1, c2, c3, c4]}
        self.fpn_sizes = [64 * 4, 128 * 4, 256 * 4, 512 * 4]
        cfg = self.cfg
        self._forward = jax.jit(lambda params, x: _encoder_forward(cfg, params, x))

    def _make_layer(self, key, planes, blocks, stride):
        downsample = (stride != 1) or (self.inplanes != planes * 4)
        keys = jax.random.split(key, blocks)
        ps, cs = [], []
        p, c = _make_block(keys[0], self.inplanes, planes, self.groups,
                           self.reduction, stride, downsample)
        ps.append(p)
        cs.append(c)
        self.inplanes = planes * 4
        for i in range(1, blocks):
            p, c = _make_block(keys[i], self.inplanes, planes, self.groups,
                               self.reduction, 1, False)
            ps.append(p)
            cs.append(c)
        return ps, cs

    def __call__(self, x_nchw):
        return self._forward(self.params, x_nchw)


if __name__ == "__main__":
    key = jax.random.PRNGKey(0)
    kparams, kx = jax.random.split(key)

    # Sanity-check the super-group grouped-conv lowering against XLA's grouped conv.
    kc1, kc2 = jax.random.split(jax.random.PRNGKey(1))
    xt = jax.random.normal(kc1, (2, 8, 8, 256), jnp.float32)
    wt = 0.1 * jax.random.normal(kc2, (256, 8, 3, 3), jnp.float32)
    w_sg = _prep_grouped_w(wt, jnp.ones((256,), jnp.float32), 32)
    got = grouped_conv3x3(xt.astype(jnp.bfloat16), w_sg,
                          jnp.zeros((1, 256), jnp.float32), stride=1)
    ref = jnp.maximum(jax.lax.conv_general_dilated(
        xt, jnp.transpose(wt, (2, 3, 1, 0)), (1, 1), 'SAME',
        dimension_numbers=('NHWC', 'HWIO', 'NHWC'), feature_group_count=32), 0.0)
    err = float(jnp.max(jnp.abs(got.astype(jnp.float32) - ref)))
    assert err < 0.15, err

    # Small configuration: one SEResNeXt bottleneck per stage, 64x64 single-channel input.
    enc = SeResNetXtEncoderPallas(layers=[1, 1, 1, 1], key=kparams)
    x = jax.random.normal(kx, (2, 1, 64, 64), jnp.float32)

    x1, x2, x3, x4 = jax.block_until_ready(enc(x))

    assert x1.shape == (2, 256, 16, 16), x1.shape
    assert x2.shape == (2, 512, 8, 8), x2.shape
    assert x3.shape == (2, 1024, 4, 4), x3.shape
    assert x4.shape == (2, 2048, 2, 2), x4.shape
    assert all(o.dtype == jnp.float32 for o in (x1, x2, x3, x4))
    assert all(bool(jnp.isfinite(o).all()) for o in (x1, x2, x3, x4))

    print("KERNEL_OK")
</pallas_src>

<mosaic_0001>
module attributes {stable_mosaic.version = 11 : i64} {
  func.func @_grouped_conv_kernel(%arg0: i32, %arg1: i32, %arg2: memref<1x128x1152xbf16, #tpu.memory_space<vmem>>, %arg3: memref<1x1152x128xbf16, #tpu.memory_space<vmem>>, %arg4: memref<1x128xf32, #tpu.memory_space<vmem>>, %arg5: memref<128x128xbf16, #tpu.memory_space<vmem>>) attributes {dimension_semantics = [#tpu.dimension_semantics<parallel>, #tpu.dimension_semantics<parallel>], iteration_bounds = array<i64: 2, 1>, scalar_prefetch = 0 : i64, scratch_operands = 0 : i64, tpu.core_type = #tpu.core_type<tc>, window_params = [{transform_indices = @transform_0, window_bounds = array<i64: 1, 128, 1152>}, {transform_indices = @transform_1, window_bounds = array<i64: 1, 1152, 128>}, {transform_indices = @transform_2, window_bounds = array<i64: 1, 128>}, {transform_indices = @transform_3, window_bounds = array<i64: 128, 128>}]} {
    %c0 = arith.constant 0 : index
    %c0_0 = arith.constant 0 : index
    %c0_1 = arith.constant 0 : index
    %0 = vector.load %arg2[%c0, %c0_0, %c0_1] : memref<1x128x1152xbf16, #tpu.memory_space<vmem>>, vector<1x128x1152xbf16>
    %1 = vector.shape_cast %0 : vector<1x128x1152xbf16> to vector<128x1152xbf16>
    %c0_2 = arith.constant 0 : index
    %c0_3 = arith.constant 0 : index
    %c0_4 = arith.constant 0 : index
    %2 = vector.load %arg3[%c0_2, %c0_3, %c0_4] : memref<1x1152x128xbf16, #tpu.memory_space<vmem>>, vector<1x1152x128xbf16>
    %3 = vector.shape_cast %2 : vector<1x1152x128xbf16> to vector<1152x128xbf16>
    %cst = arith.constant dense<0.000000e+00> : vector<128x128xf32>
    %4 = tpu.matmul %1, %3, %cst {dimension_numbers = #tpu.dot_dimension_numbers<[1], [0], [0], [1], [0, 0, 1, 1], [], []>} : vector<128x1152xbf16>, vector<1152x128xbf16>, vector<128x128xf32> -> vector<128x128xf32>
    %c0_5 = arith.constant 0 : index
    %c0_6 = arith.constant 0 : index
    %5 = vector.load %arg4[%c0_5, %c0_6] : memref<1x128xf32, #tpu.memory_space<vmem>>, vector<1x128xf32>
    %6 = vector.broadcast %5 : vector<1x128xf32> to vector<128x128xf32>
    %7 = arith.addf %4, %6 : vector<128x128xf32>
    %cst_7 = arith.constant 0.000000e+00 : f32
    %8 = vector.broadcast %cst_7 : f32 to vector<128x128xf32>
    %9 = arith.maximumf %7, %8 : vector<128x128xf32>
    %10 = arith.truncf %9 : vector<128x128xf32> to vector<128x128xbf16>
    %c0_8 = arith.constant 0 : index
    %c0_9 = arith.constant 0 : index
    %11 = vector.load %arg5[%c0_8, %c0_9] : memref<128x128xbf16, #tpu.memory_space<vmem>>, vector<128x128xbf16>
    tpu.vector_store %arg5[%c0_8, %c0_9], %10 {strides = array<i32>} : memref<128x128xbf16, #tpu.memory_space<vmem>>, vector<128x128xbf16>,
    return
  }
  func.func @transform_0(%arg0: i32, %arg1: i32) -> (i32, i32, i32) {
    %c0_i32 = arith.constant 0 : i32
    %c0_i32_0 = arith.constant 0 : i32
    return %arg0, %arg1, %c0_i32 : i32, i32, i32
  }
  func.func @transform_1(%arg0: i32, %arg1: i32) -> (i32, i32, i32) {
    %c0_i32 = arith.constant 0 : i32
    %c0_i32_0 = arith.constant 0 : i32
    %c0_i32_1 = arith.constant 0 : i32
    return %arg0, %c0_i32, %c0_i32_0 : i32, i32, i32
  }
  func.func @transform_2(%arg0: i32, %arg1: i32) -> (i32, i32) {
    %c0_i32 = arith.constant 0 : i32
    %c0_i32_0 = arith.constant 0 : i32
    return %c0_i32, %arg0 : i32, i32
  }
  func.func @transform_3(%arg0: i32, %arg1: i32) -> (i32, i32) {
    %c0_i32 = arith.constant 0 : i32
    return %arg1, %arg0 : i32, i32
  }
}

</mosaic_0001>

<bundles_post_ra>
// kernel: tpu_custom_call.1
= control target key start
LH: loop header
LB: loop body
LE: loop exit
PB: predicated region body
PF: predicated region fallthrough
CT: control target
= control target key end

     0   :  { %8 = vsyncpa [#allocation3], 0  ;;  %s3491_s0 = inlined_call_operand.hbm [shape: bf16[2,128,1152], index: 0, kind: input, shape index: {}]   ;;  %s3492_s1 = inlined_call_operand.hbm [shape: bf16[2,1152,128], index: 1, kind: input, shape index: {}]   ;;  %s3493_s2 = inlined_call_operand.vmem [shape: f32[1,256], index: 2, kind: input, shape index: {}]   ;;  %s3494_s3 = inlined_call_operand.hbm [shape: bf16[128,256], index: 3, kind: output, shape index: {}]  }
   0x1   :  { %10 = vsyncpa [#allocation3 + $0x1], 0 }
   0x2   :  { %11 = vsyncpa [#allocation6], 0 }
   0x3   :  { %13 = vsyncpa [#allocation6 + $0x1], 0 }
   0x4   :  { %14 = vsyncpa [#allocation4], 0 }
   0x5   :  { %16 = vsyncpa [#allocation4 + $0x1], 0  ;;  %s3000_s12 = smov 0   ;;  %s3002_s13 = smov 0  }
   0x6   :  { %s3004_s14 = smov 0   ;;  %s3006_s15 = smov 0  }
   0x7   :  { %s3008_s16 = smov 0   ;;  %s3010_s17 = smov 0  }
   0x8 LB: > { %s2011_s18 = sadd.s32 4294967295, %s2968_s17   ;;  %s2012_s19 = sadd.s32 4294967294, %s2968_s17   ;;  %s2968_s17 = sphi %s3010_s17, %s22_s17   ;;  %s2964_s16 = sphi %s3008_s16, %s3512_s16   ;;  %s2960_s15 = sphi %s3006_s15, %s3511_s15   ;;  %s2956_s14 = sphi %s3004_s14, %s3510_s14   ;;  %s2952_s13 = sphi %s3002_s13, %s3509_s13   ;;  %s2948_s12 = sphi %s3000_s12, %s3508_s12  }
   0x9   : > { %s34_s20 = sadd.s32 1, %s2964_s16  ;;  %s43_s21 = sadd.s32 1, %s2956_s14 }
   0xa   : > { %p36_p0 = scmp.ge.s32.totalorder %s34_s20, 2  ;;  %p50_p1 = scmp.ne.s32.totalorder %s2956_s14, %s2952_s13 }
   0xb   : > { %p51_p2 = scmp.eq.s32.totalorder %s2968_s17, 0  ;;  %p56_p3 = scmp.ne.s32.totalorder %s2952_s13, %s2948_s12 }
   0xc   : > { %s3514_s20 = smov (%p36_p0, %s34_s20), 0  ;;  %p57_p5 = scmp.eq.s32.totalorder %s2011_s18, 0 }
   0xd   : > { %p3041_p4 = por %p51_p2, %p50_p1  ;;  %s38_s23 = ssub.s32 %s2964_s16, %s3514_s20 }
   0xe   : > { %p134_p6 = scmp.eq.s32.totalorder %s2011_s18, 1  ;;  %p41_p7 = scmp.eq.s32.totalorder %s38_s23, 0 }
   0xf   : > { %p3047_p8 = por %p57_p5, %p56_p3  ;;  %p140_p10 = scmp.eq.s32.totalorder %s2012_s19, 1 }
  0x10   : > { %p3051_p9 = por %p134_p6, %p50_p1  ;;  %p2589_p13 = scmp.lt.s32.totalorder %s2968_s17, 2 }
  0x11   : > { %s3498_s24 = scalar_select %p3047_p8, 1, 0 }
  0x12   : > { %s3499_s25 = scalar_select %p3051_p9, 1, 0 }
  0x13   : > { %s3056_s26 = scalar_select %p41_p7, %s2956_s14, %s43_s21  }
  0x14   : > { %p3058_p11 = por %p140_p10, %p56_p3  ;;  %s3065_s28 = sand.u32 1, %s2956_s14  }
  0x15   : > { %s2567_s29 = smul.u32 576, %s3065_s28  ;;  %p3071_p0 = pnand %p2589_p13, %p3041_p4 }
  0x16   : > { %s3500_s27 = scalar_select %p3058_p11, 1, 0 }
  0x17   : > { %s2568_s30 = smul.u32 9216, %s2964_s16  ;;  %s164_s8 = scalar_lea.vmem [#allocation2], %s2567_s29 }
  0x18   : > { %s174_s9 = sshll.u32 %s164_s8, 4  ;;  %s161_s10 = scalar_lea.sflag [#allocation3], %s3065_s28  ;;  %s3084_s9 = int_to_ptr.vmem [resolvable:$true] %s174_s9 }
  0x19   : > { %s3080_s7 = scalar_lea.hbm %s3491_s0, %s2568_s30  ;;  %p2824_p3 = pneg %p3071_p0 }
  0x1a   : > { %s2822_s11 = scalar_lea.hbm %s3080_s7, 9216  ;;  %s2827_s21 = scalar_lea.hbm %s3491_s0, 18432 }
  0x1b   : > { %p2823_p2 = scmp.ne.s32.totalorder %s3080_s7, %s2822_s11  ;;  %p2828_p6 = scmp.lt.u32.totalorder %s3080_s7, %s3491_s0 }
  0x1c   : > { %p2829_p7 = scmp.lt.u32.totalorder %s2827_s21, %s2822_s11  ;;  %p2831_p13 = scmp.lt.u32.totalorder %s2822_s11, %s3080_s7 }
  0x1d   : > { %p2825_p4 = pnand %p2824_p3, %p2823_p2 }
  0x1e   : > { %p2830_p10 = por %p2829_p7, %p2828_p6 }
  0x1f   : > { %p2826_p5 = pneg %p2825_p4 }
  0x20   : > { %p2832_p12 = por %p2831_p13, %p2830_p10 }
  0x22   : > { %p2833_p1 = pnand %p2832_p12, %p2826_p5 }
  0x24   : > { %2836 = shalt.err (!%p2833_p1)
}
  0x25   : > { %s2837_s5 = scalar_lea.vmem %s3084_s9, 9216  ;;  %s2970_s6 = smov [#allocation2]  }
  0x26   : > { %p2838_p2 = scmp.ne.s32.totalorder %s3084_s9, %s2837_s5  ;;  %s2842_s8 = sshll.u32 %s2970_s6, 4  ;;  %s2843_s8 = int_to_ptr.vmem [resolvable:$false] %s2842_s8 }
  0x27   : > { %s2844_s18 = scalar_lea.vmem %s2843_s8, 18432  ;;  %p2845_p9 = scmp.lt.s32.totalorder %s3084_s9, %s2843_s8 }
  0x28   : > { %p2840_p4 = pnand %p2838_p2, %p2824_p3  ;;  %p2846_p6 = scmp.lt.s32.totalorder %s2844_s18, %s2837_s5 }
  0x2a   : > { %p2841_p11 = pneg %p2840_p4  ;;  %p2847_p7 = por %p2846_p6, %p2845_p9 }
  0x2c   : > { %p2848_p10 = pnand %p2847_p7, %p2841_p11 }
  0x2e   : > { %2851 = shalt.err (!%p2848_p10)
}
  0x2f   : > { %s2971_s11 = smov 576   ;;  %s2972_s19 = smov 36  }
  0x30   : > { %2581 = dma.hbm_to_vmem [thread:$0]  (!%p3071_p0), %s3080_s7, 9216, %s3084_s9, %s161_s10, %s2971_s11, %s2971_s11, %s2972_s19  }
  0x31   : > { %p209_p12 = scmp.lt.s32.totalorder %s2968_s17, 3  ;;  %s3121_s23 = scalar_lea.hbm %s3492_s1, %s2568_s30 }
  0x32   : > { %p3502_p9 = scmp.ge.s32.totalorder %s2968_s17, 1  ;;  %s188_s6 = scalar_lea.vmem [#allocation5], %s2567_s29 }
  0x33   : > { %s195_s8 = sshll.u32 %s188_s6, 4  ;;  %s185_s7 = scalar_lea.sflag [#allocation6], %s3065_s28  ;;  %s3131_s8 = int_to_ptr.vmem [resolvable:$true] %s195_s8 }
  0x34   : > { %p3125_p11 = pnand %p3502_p9, %p209_p12  ;;  %s2852_s9 = scalar_lea.hbm %s3121_s23, 9216 }
  0x35   : > { %p2853_p1 = scmp.ne.s32.totalorder %s3121_s23, %s2852_s9  ;;  %s2857_s18 = scalar_lea.hbm %s3492_s1, 18432 }
  0x36   : > { %p2858_p2 = scmp.lt.u32.totalorder %s3121_s23, %s3492_s1  ;;  %p2859_p4 = scmp.lt.u32.totalorder %s2857_s18, %s2852_s9 }
  0x37   : > { %p2855_p5 = pnand %p2853_p1, %p2824_p3  ;;  %p2861_p7 = scmp.lt.u32.totalorder %s2852_s9, %s3121_s23 }
  0x38   : > { %p2860_p6 = por %p2859_p4, %p2858_p2 }
  0x39   : > { %p2856_p13 = pneg %p2855_p5 }
  0x3a   : > { %p2862_p10 = por %p2861_p7, %p2860_p6 }
  0x3c   : > { %p2863_p12 = pnand %p2862_p10, %p2856_p13 }
  0x3e   : > { %2866 = shalt.err (!%p2863_p12)
}
  0x3f   : > { %s2867_s29 = scalar_lea.vmem %s3131_s8, 9216  ;;  %s2973_s21 = smov [#allocation5]  }
  0x40   : > { %p2868_p9 = scmp.ne.s32.totalorder %s3131_s8, %s2867_s29  ;;  %s2872_s22 = sshll.u32 %s2973_s21, 4  ;;  %s2873_s22 = int_to_ptr.vmem [resolvable:$false] %s2872_s22 }
  0x41   : > { %s2874_s6 = scalar_lea.vmem %s2873_s22, 18432  ;;  %p2875_p8 = scmp.lt.s32.totalorder %s3131_s8, %s2873_s22 }
  0x42   : > { %p2870_p1 = pnand %p2868_p9, %p2824_p3  ;;  %p2876_p2 = scmp.lt.s32.totalorder %s2874_s6, %s2867_s29 }
  0x44   : > { %p2871_p5 = pneg %p2870_p1  ;;  %p2877_p4 = por %p2876_p2, %p2875_p8 }
  0x46   : > { %p2878_p6 = pnand %p2877_p4, %p2871_p5 }
  0x48   : > { %2881 = shalt.err (!%p2878_p6)
}
  0x49   : > { %s2974_s9 = smov 64   ;;  %s2975_s30 = smov 4  }
  0x4a   : > { %2584 = dma.hbm_to_vmem [thread:$0]  (!%p3071_p0), %s3121_s23, 9216, %s3131_s8, %s185_s7, %s2974_s9, %s2974_s9, %s2975_s30  }
  0x4b   : > { %213 = sbr.rel (%p3125_p11) target bundleno = 493 (0x1ed), region = 32  ;;  %s3162_s10 = sand.u32 (!%p3125_p11), 1, %s2952_s13  }
  0x4c   : > { %s2571_s18 = smul.u32 (!%p3125_p11), 576, %s3162_s10  ;;  %s216_s11 = scalar_lea.sflag (!%p3125_p11), [#allocation3], %s3162_s10 }
  0x4d   : > { %p3504_p8 = scmp.ne.s32.totalorder (!%p3125_p11), %s3498_s24, 0 }
  0x4e   : > { %s3166_s19 = scalar_lea.vmem (!%p3125_p11), [#allocation2], %s2571_s18 }
  0x52   : > { %2935 = dma.done.wait (%p3504_p8), %s216_s11, 9216  }
  0x53   : > { %2937 = vsyncadd (%p3504_p8), %s216_s11, 4294958080  ;;  %s225_s28 = scalar_lea.sflag [#allocation6], %s3162_s10  ;;  %s3173_s4 = scalar_lea.vmem [#allocation5], %s2571_s18 }
  0x54   : > { %2939 = dma.done.wait (%p3504_p8), %s225_s28, 9216  }
  0x55   : > { %2941 = vsyncadd (%p3504_p8), %s225_s28, 4294958080  ;;  %v2646_v0 = vld [vmem:[%s3173_s4 + $0x40] sm:$0xff]   ;;  %v2650_v4 = vld [vmem:[%s3173_s4 + $0x48] sm:$0xff]   ;;  %p260_p0 = scmp.lt.s32.totalorder %s2960_s15, 1  ;;  %s2018_s7 = sshll.u32 %s3162_s10, 6 }
  0x56   : > { %v2647_v1 = vld [vmem:[%s3173_s4 + $0xc0] sm:$0xff]   ;;  %2247 = vmatprep.subr.bf16.mxu0 %v2646_v0  ;;  %v2651_v5 = vld [vmem:[%s3173_s4 + $0xc8] sm:$0xff]   ;;  %v2654_v8 = vld [vmem:[%s3173_s4 + $0x50] sm:$0xff]   ;;  %s3420_s29 = scalar_lea.vmem [#allocation7], %s2018_s7  ;;  %s2181_s22 = sshll.u32 %s2960_s15, 6 }
  0x57   : > { %v2648_v2 = vld [vmem:[%s3173_s4] sm:$0xff]   ;;  %2311 = vmatprep.subr.bf16.mxu1 %v2647_v1  ;;  %v2652_v6 = vld [vmem:[%s3173_s4 + $0x8] sm:$0xff]   ;;  %v2655_v9 = vld [vmem:[%s3173_s4 + $0xd0] sm:$0xff]   ;;  %s261_s24 = scalar_select %p260_p0, %s2960_s15, 1 }
  0x58   : > { %v2649_v3 = vld [vmem:[%s3173_s4 + $0x80] sm:$0xff]   ;;  %2248 = vmatpush3.bf16.msra.mxu0 %v2648_v2  ;;  %v2653_v7 = vld [vmem:[%s3173_s4 + $0x88] sm:$0xff]   ;;  %v2656_v10 = vld [vmem:[%s3173_s4 + $0x10] sm:$0xff]   ;;  %s1893_s21 = sshll.u32 %s3420_s29, 4  ;;  %s3438_s15 = scalar_lea.hbm %s3494_s3, %s2181_s22  ;;  %s3433_s21 = int_to_ptr.vmem [resolvable:$true] %s1893_s21 }
  0x59   : > { %2312 = vmatpush3.bf16.msra.mxu1 %v2649_v3  ;;  %2249 = vmatprep.subr.bf16.mxu0 %v2650_v4  ;;  %v2657_v11 = vld [vmem:[%s3173_s4 + $0x90] sm:$0xff]   ;;  %v2658_v12 = vld [vmem:[%s3173_s4 + $0x58] sm:$0xff]   ;;  %v2662_v16 = vld [vmem:[%s3173_s4 + $0x60] sm:$0xff]   ;;  %s262_s8 = scalar_lea.vmem %s3493_s2, %s261_s24  ;;  %s1878_s30 = scalar_lea.sflag [#allocation4], %s3162_s10 }
  0x5a   : > { %2313 = vmatprep.subr.bf16.mxu1 %v2651_v5  ;;  %v2659_v13 = vld [vmem:[%s3173_s4 + $0xd8] sm:$0xff]   ;;  %v2663_v17 = vld [vmem:[%s3173_s4 + $0xe0] sm:$0xff]   ;;  %v2666_v20 = vld [vmem:[%s3173_s4 + $0x68] sm:$0xff]   ;;  %s2882_s18 = scalar_lea.vmem %s3433_s21, 1024  ;;  %p3505_p11 = scmp.ne.s32.totalorder %s3499_s25, 0 }
  0x5b   : > { %v2660_v14 = vld [vmem:[%s3173_s4 + $0x18] sm:$0xff]   ;;  %v2664_v18 = vld [vmem:[%s3173_s4 + $0x20] sm:$0xff]   ;;  %v2667_v21 = vld [vmem:[%s3173_s4 + $0xe8] sm:$0xff]   ;;  %p2883_p3 = scmp.ne.s32.totalorder %s3433_s21, %s2882_s18  ;;  %s2976_s11 = smov [#allocation7]  }
  0x5c   : > { %2250 = vmatpush3.bf16.msra.mxu0 %v2652_v6  ;;  %v2661_v15 = vld [vmem:[%s3173_s4 + $0x98] sm:$0xff]   ;;  %v2665_v19 = vld [vmem:[%s3173_s4 + $0xa0] sm:$0xff]   ;;  %v2668_v22 = vld [vmem:[%s3173_s4 + $0x28] sm:$0xff]  }
  0x5d   : > { %2314 = vmatpush3.bf16.msra.mxu1 %v2653_v7  ;;  %2251 = vmatprep.subr.bf16.mxu0 %v2654_v8  ;;  %v2669_v23 = vld [vmem:[%s3173_s4 + $0xa8] sm:$0xff]   ;;  %v2670_v24 = vld [vmem:[%s3173_s4 + $0x70] sm:$0xff]   ;;  %v2674_v28 = vld [vmem:[%s3173_s4 + $0x78] sm:$0xff]   ;;  %p2884_p13 = pnand %p2883_p3, %p3505_p11 }
  0x5e   : > { %2315 = vmatprep.subr.bf16.mxu1 %v2655_v9  ;;  %v2671_v25 = vld [vmem:[%s3173_s4 + $0xf0] sm:$0xff]   ;;  %v2675_v29 = vld [vmem:[%s3173_s4 + $0xf8] sm:$0xff]   ;;  %v2678_v32 = vld [vmem:[%s3166_s19] ss:$36 sps:$4 sm:$0xff]  }
  0x5f   : > { %v2672_v26 = vld [vmem:[%s3173_s4 + $0x30] sm:$0xff]   ;;  %v2676_v30 = vld [vmem:[%s3173_s4 + $0x38] sm:$0xff]   ;;  %v2680_v33 = vld [vmem:[%s3166_s19 + $0x4] ss:$36 sps:$4 sm:$0xff]   ;;  %p2885_p7 = pneg %p2884_p13 }
  0x60   : > { %2252 = vmatpush3.bf16.msra.mxu0 %v2656_v10  ;;  %v2673_v27 = vld [vmem:[%s3173_s4 + $0xb0] sm:$0xff]   ;;  %v2677_v31 = vld [vmem:[%s3173_s4 + $0xb8] sm:$0xff]   ;;  %v2681_v34 = vld [vmem:[%s3166_s19 + $0x8] ss:$36 sps:$4 sm:$0xff]   ;;  %1328 = vmatprep.mubr.bf16.mxu0 %v2680_v33 }
  0x61   : > { %2316 = vmatpush3.bf16.msra.mxu1 %v2657_v11  ;;  %2253 = vmatprep.subr.bf16.mxu0 %v2658_v12  ;;  %v2683_v35 = vld [vmem:[%s3166_s19 + $0xc] ss:$36 sps:$4 sm:$0xff]   ;;  %v2684_v36 = vld [vmem:[%s3173_s4 + $0x140] sm:$0xff]   ;;  %v2690_v41 = vld [vmem:[%s3166_s19 + $0x54] ss:$36 sps:$4 sm:$0xff]  }
  0x62   : > { %2317 = vmatprep.subr.bf16.mxu1 %v2659_v13  ;;  %1425 = vmatprep.mubr.bf16.mxu1 %v2683_v35  ;;  %v2685_v37 = vld [vmem:[%s3173_s4 + $0x1c0] sm:$0xff]   ;;  %v2688_v40 = vld [vmem:[%s3166_s19 + $0x4c] ss:$36 sps:$4 sm:$0xff]   ;;  %v2698_v48 = vld [vmem:[%s3166_s19 + $0x94] ss:$36 sps:$4 sm:$0xff]  }
  0x63   : > { %v2686_v38 = vld [vmem:[%s3173_s4 + $0x100] sm:$0xff]   ;;  %v2692_v42 = vld [vmem:[%s3166_s19 + $0x48] ss:$36 sps:$4 sm:$0xff]   ;;  %v2693_v43 = vld [vmem:[%s3166_s19 + $0x50] ss:$36 sps:$4 sm:$0xff]  }
  0x64   : > { %2254 = vmatpush3.bf16.msra.mxu0 %v2660_v14  ;;  %v2687_v39 = vld [vmem:[%s3173_s4 + $0x180] sm:$0xff]   ;;  %v2694_v44 = vld [vmem:[%s3173_s4 + $0x148] sm:$0xff]   ;;  %v2702_v50 = vld [vmem:[%s3166_s19 + $0x90] ss:$36 sps:$4 sm:$0xff]  }
  0x65   : > { %2318 = vmatpush3.bf16.msra.mxu1 %v2661_v15  ;;  %2255 = vmatprep.subr.bf16.mxu0 %v2662_v16  ;;  %v2695_v45 = vld [vmem:[%s3173_s4 + $0x1c8] sm:$0xff]   ;;  %v2700_v49 = vld [vmem:[%s3166_s19 + $0x9c] ss:$36 sps:$4 sm:$0xff]   ;;  %v2704_v52 = vld [vmem:[%s3173_s4 + $0x150] sm:$0xff]  }
  0x66   : > { %2319 = vmatprep.subr.bf16.mxu1 %v2663_v17  ;;  %v2696_v46 = vld [vmem:[%s3173_s4 + $0x108] sm:$0xff]   ;;  %v2703_v51 = vld [vmem:[%s3166_s19 + $0x98] ss:$36 sps:$4 sm:$0xff]   ;;  %v2705_v53 = vld [vmem:[%s3173_s4 + $0x1d0] sm:$0xff]  }
  0x67   : > { %v2697_v47 = vld [vmem:[%s3173_s4 + $0x188] sm:$0xff]   ;;  %v2706_v54 = vld [vmem:[%s3173_s4 + $0x110] sm:$0xff]   ;;  %v2708_v56 = vld [vmem:[%s3166_s19 + $0xdc] ss:$36 sps:$4 sm:$0xff]  }
  0x68   : > { %2256 = vmatpush3.bf16.msra.mxu0 %v2664_v18  ;;  %v2707_v55 = vld [vmem:[%s3173_s4 + $0x190] sm:$0xff]   ;;  %v2710_v57 = vld [vmem:[%s3166_s19 + $0xe4] ss:$36 sps:$4 sm:$0xff]   ;;  %v2712_v58 = vld [vmem:[%s3166_s19 + $0xd8] ss:$36 sps:$4 sm:$0xff]  }
  0x69   : > { %2320 = vmatpush3.bf16.msra.mxu1 %v2665_v19  ;;  %2257 = vmatprep.subr.bf16.mxu0 %v2666_v20  ;;  %v2713_v59 = vld [vmem:[%s3166_s19 + $0xe0] ss:$36 sps:$4 sm:$0xff]   ;;  %v2714_v60 = vld [vmem:[%s3173_s4 + $0x158] sm:$0xff]   ;;  %v2720_v1 = vld [vmem:[%s3166_s19 + $0x12c] ss:$36 sps:$4 sm:$0xff]  }
  0x6a   : > { %2321 = vmatprep.subr.bf16.mxu1 %v2667_v21  ;;  %v2715_v61 = vld [vmem:[%s3173_s4 + $0x1d8] sm:$0xff]   ;;  %v2718_v0 = vld [vmem:[%s3166_s19 + $0x124] ss:$36 sps:$4 sm:$0xff]   ;;  %v2728_v8 = vld [vmem:[%s3166_s19 + $0x16c] ss:$36 sps:$4 sm:$0xff]  }
  0x6b   : > { %v2716_v62 = vld [vmem:[%s3173_s4 + $0x118] sm:$0xff]   ;;  %v2722_v2 = vld [vmem:[%s3166_s19 + $0x120] ss:$36 sps:$4 sm:$0xff]   ;;  %v2723_v4 = vld [vmem:[%s3166_s19 + $0x128] ss:$36 sps:$4 sm:$0xff]  }
  0x6c   : > { %2258 = vmatpush3.bf16.msra.mxu0 %v2668_v22  ;;  %v2717_v63 = vld [vmem:[%s3173_s4 + $0x198] sm:$0xff]   ;;  %v2724_v3 = vld [vmem:[%s3173_s4 + $0x160] sm:$0xff]   ;;  %v2734_v10 = vld [vmem:[%s3173_s4 + $0x168] sm:$0xff]  }
  0x6d   : > { %2322 = vmatpush3.bf16.msra.mxu1 %v2669_v23  ;;  %2259 = vmatprep.subr.bf16.mxu0 %v2670_v24  ;;  %v2725_v5 = vld [vmem:[%s3173_s4 + $0x1e0] sm:$0xff]   ;;  %v2730_v9 = vld [vmem:[%s3166_s19 + $0x174] ss:$36 sps:$4 sm:$0xff]   ;;  %v2735_v11 = vld [vmem:[%s3173_s4 + $0x1e8] sm:$0xff]  }
  0x6e   : > { %2323 = vmatprep.subr.bf16.mxu1 %v2671_v25  ;;  %v2726_v6 = vld [vmem:[%s3173_s4 + $0x120] sm:$0xff]   ;;  %v2732_v12 = vld [vmem:[%s3166_s19 + $0x168] ss:$36 sps:$4 sm:$0xff]   ;;  %v2733_v15 = vld [vmem:[%s3166_s19 + $0x170] ss:$36 sps:$4 sm:$0xff]  }
  0x6f   : > { %v2727_v7 = vld [vmem:[%s3173_s4 + $0x1a0] sm:$0xff]   ;;  %v2736_v13 = vld [vmem:[%s3173_s4 + $0x128] sm:$0xff]   ;;  %v2738_v16 = vld [vmem:[%s3166_s19 + $0x1b4] ss:$36 sps:$4 sm:$0xff]  }
  0x70   : > { %2260 = vmatpush3.bf16.msra.mxu0 %v2672_v26  ;;  %v2737_v14 = vld [vmem:[%s3173_s4 + $0x1a8] sm:$0xff]   ;;  %v2740_v17 = vld [vmem:[%s3166_s19 + $0x1bc] ss:$36 sps:$4 sm:$0xff]   ;;  %v2744_v18 = vld [vmem:[%s3173_s4 + $0x170] sm:$0xff]  }
  0x71   : > { %2324 = vmatpush3.bf16.msra.mxu1 %v2673_v27  ;;  %2261 = vmatprep.subr.bf16.mxu0 %v2674_v28  ;;  %v2745_v19 = vld [vmem:[%s3173_s4 + $0x1f0] sm:$0xff]   ;;  %v2743_v23 = vld [vmem:[%s3166_s19 + $0x1b8] ss:$36 sps:$4 sm:$0xff]   ;;  %v2750_v25 = vld [vmem:[%s3166_s19 + $0x204] ss:$36 sps:$4 sm:$0xff]  }
  0x72   : > { %2325 = vmatprep.subr.bf16.mxu1 %v2675_v29  ;;  %v2746_v20 = vld [vmem:[%s3173_s4 + $0x130] sm:$0xff]   ;;  %v2748_v24 = vld [vmem:[%s3166_s19 + $0x1fc] ss:$36 sps:$4 sm:$0xff]  }
  0x73   : > { %v2747_v21 = vld [vmem:[%s3173_s4 + $0x1b0] sm:$0xff]   ;;  %v2754_v26 = vld [vmem:[%s3173_s4 + $0x178] sm:$0xff]  }
  0x74   : > { %2262 = vmatpush3.bf16.msra.mxu0 %v2676_v30  ;;  %v2742_v22 = vld [vmem:[%s3166_s19 + $0x1b0] ss:$36 sps:$4 sm:$0xff]   ;;  %v2755_v27 = vld [vmem:[%s3173_s4 + $0x1f8] sm:$0xff]  }
  0x75   : > { %2326 = vmatpush3.bf16.msra.mxu1 %v2677_v31  ;;  %2375 = vmatprep.subr.bf16.mxu0 %v2684_v36  ;;  %v2756_v28 = vld [vmem:[%s3173_s4 + $0x138] sm:$0xff]   ;;  %v2753_v31 = vld [vmem:[%s3166_s19 + $0x200] ss:$36 sps:$4 sm:$0xff]   ;;  %v2758_v35 = vld [vmem:[%s3166_s19 + $0x10] ss:$36 sps:$4 sm:$0xff]  }
  0x76   : > { %2439 = vmatprep.subr.bf16.mxu1 %v2685_v37  ;;  %v2757_v29 = vld [vmem:[%s3173_s4 + $0x1b8] sm:$0xff]  }
  0x77   : > { %1329 = vmatmul.mubr.bf16.vlgmr.msra.gmra.mrb[0].mxu0 %v2678_v32  ;;  %v2752_v30 = vld [vmem:[%s3166_s19 + $0x1f8] ss:$36 sps:$4 sm:$0xff]   ;;  %v2764_v32 = vld [vmem:[%s3173_s4 + $0x200] sm:$0xff]  }
  0x78   : > { %1426 = vmatmul.mubr.bf16.vlgmr.msra.gmra.mrb[0].mxu1 %v2681_v34  ;;  %2376 = vmatpush3.bf16.msra.mxu0 %v2686_v38  ;;  %v2760_v33 = vld [vmem:[%s3166_s19 + $0x14] ss:$36 sps:$4 sm:$0xff]   ;;  %v2763_v34 = vld [vmem:[%s3166_s19 + $0x1c] ss:$36 sps:$4 sm:$0xff]   ;;  %v2767_v38 = vld [vmem:[%s3166_s19 + $0x64] ss:$36 sps:$4 sm:$0xff]  }
  0x79   : > { %2440 = vmatpush3.bf16.msra.mxu1 %v2687_v39  ;;  %1336 = vmatprep.mubr.bf16.mxu0 %v2688_v40  ;;  %v2761_v36 = vld [vmem:[%s3166_s19 + $0x18] ss:$36 sps:$4 sm:$0xff]   ;;  %v2771_v39 = vld [vmem:[%s3173_s4 + $0x208] sm:$0xff]   ;;  %v2778_v40 = vld [vmem:[%s3173_s4 + $0x210] sm:$0xff]  }
  0x7a   : > { %1433 = vmatprep.mubr.bf16.mxu1 %v2690_v41  ;;  %2377 = vmatprep.subr.bf16.mxu0 %v2694_v44  ;;  %v2765_v37 = vld [vmem:[%s3166_s19 + $0x5c] ss:$36 sps:$4 sm:$0xff]   ;;  %v2774_v44 = vld [vmem:[%s3166_s19 + $0xac] ss:$36 sps:$4 sm:$0xff]  }
  0x7b   : > { %2441 = vmatprep.subr.bf16.mxu1 %v2695_v45  ;;  %v2769_v41 = vld [vmem:[%s3166_s19 + $0x58] ss:$36 sps:$4 sm:$0xff]  }
  0x7c   : > { %2378 = vmatpush3.bf16.msra.mxu0 %v2696_v46  ;;  %v2785_v45 = vld [vmem:[%s3173_s4 + $0x218] sm:$0xff]   ;;  %v2792_v46 = vld [vmem:[%s3173_s4 + $0x220] sm:$0xff]  }
  0x7d   : > { %2442 = vmatpush3.bf16.msra.mxu1 %v2697_v47  ;;  %2379 = vmatprep.subr.bf16.mxu0 %v2704_v52  ;;  %v2776_v47 = vld [vmem:[%s3166_s19 + $0xa0] ss:$36 sps:$4 sm:$0xff]   ;;  %v2783_v52 = vld [vmem:[%s3166_s19 + $0xe8] ss:$36 sps:$4 sm:$0xff]  }
  0x7e   : > { %2443 = vmatprep.subr.bf16.mxu1 %v2705_v53  ;;  %v2806_v53 = vld [vmem:[%s3173_s4 + $0x230] sm:$0xff]  }
  0x7f   : > { %1337 = vmatmul.mubr.bf16.gmra.mrb[4].mxu0 %v2692_v42  ;;  %v2770_v42 = vld [vmem:[%s3166_s19 + $0x60] ss:$36 sps:$4 sm:$0xff]  }
  0x80   : > { %1434 = vmatmul.mubr.bf16.gmra.mrb[4].mxu1 %v2693_v43  ;;  %1344 = vmatprep.mubr.bf16.mxu0 %v2698_v48  ;;  %v2772_v43 = vld [vmem:[%s3166_s19 + $0xa4] ss:$36 sps:$4 sm:$0xff]  }
  0x81   : > { %1441 = vmatprep.mubr.bf16.mxu1 %v2700_v49  ;;  %2380 = vmatpush3.bf16.msra.mxu0 %v2706_v54  ;;  %v2777_v48 = vld [vmem:[%s3166_s19 + $0xa8] ss:$36 sps:$4 sm:$0xff]   ;;  %v2784_v54 = vld [vmem:[%s3166_s19 + $0xf0] ss:$36 sps:$4 sm:$0xff]  }
  0x82   : > { %2444 = vmatpush3.bf16.msra.mxu1 %v2707_v55  ;;  %2381 = vmatprep.subr.bf16.mxu0 %v2714_v60  ;;  %v2779_v49 = vld [vmem:[%s3166_s19 + $0xec] ss:$36 sps:$4 sm:$0xff]   ;;  %v2786_v55 = vld [vmem:[%s3166_s19 + $0x134] ss:$36 sps:$4 sm:$0xff]   ;;  %v2793_v60 = vld [vmem:[%s3166_s19 + $0x17c] ss:$36 sps:$4 sm:$0xff]  }
  0x83   : > { %2445 = vmatprep.subr.bf16.mxu1 %v2715_v61  ;;  %v2795_v61 = vld [vmem:[%s3166_s19 + $0x184] ss:$36 sps:$4 sm:$0xff]  }
  0x85   : > { %2382 = vmatpush3.bf16.msra.mxu0 %v2716_v62  ;;  %v2797_v62 = vld [vmem:[%s3166_s19 + $0x178] ss:$36 sps:$4 sm:$0xff]  }
  0x86   : > { %2446 = vmatpush3.bf16.msra.mxu1 %v2717_v63  ;;  %2383 = vmatprep.subr.bf16.mxu0 %v2724_v3  ;;  %v2798_v63 = vld [vmem:[%s3166_s19 + $0x180] ss:$36 sps:$4 sm:$0xff]   ;;  %v2805_v3 = vld [vmem:[%s3166_s19 + $0x1c8] ss:$36 sps:$4 sm:$0xff]  }
  0x87   : > { %1345 = vmatmul.mubr.bf16.gmra.mrb[8].mxu0 %v2702_v50  ;;  %2447 = vmatprep.subr.bf16.mxu1 %v2725_v5  ;;  %v2781_v50 = vld [vmem:[%s3166_s19 + $0xf4] ss:$36 sps:$4 sm:$0xff]  }
  0x88   : > { %1442 = vmatmul.mubr.bf16.gmra.mrb[8].mxu1 %v2703_v51  ;;  %1352 = vmatprep.mubr.bf16.mxu0 %v2708_v56  ;;  %v2799_v51 = vld [vmem:[%s3173_s4 + $0x228] sm:$0xff]   ;;  %v2788_v56 = vld [vmem:[%s3166_s19 + $0x13c] ss:$36 sps:$4 sm:$0xff]   ;;  %v2809_v5 = vld [vmem:[%s3166_s19 + $0x214] ss:$36 sps:$4 sm:$0xff]  }
  0x89   : > { %1449 = vmatprep.mubr.bf16.mxu1 %v2710_v57  ;;  %2384 = vmatpush3.bf16.msra.mxu0 %v2726_v6  ;;  %v2813_v57 = vld [vmem:[%s3173_s4 + $0x238] sm:$0xff]   ;;  %v2811_v6 = vld [vmem:[%s3166_s19 + $0x208] ss:$36 sps:$4 sm:$0xff]  }
  0x8a   : > { %2448 = vmatpush3.bf16.msra.mxu1 %v2727_v7  ;;  %2385 = vmatprep.subr.bf16.mxu0 %v2734_v10  ;;  %v2812_v7 = vld [vmem:[%s3166_s19 + $0x210] ss:$36 sps:$4 sm:$0xff]   ;;  %v2816_v10 = vld [vmem:[%s3166_s19 + $0x68] ss:$36 sps:$4 sm:$0xff]  }
  0x8b   : > { %2449 = vmatprep.subr.bf16.mxu1 %v2735_v11  ;;  %v2817_v11 = vld [vmem:[%s3166_s19 + $0x188] ss:$36 sps:$4 sm:$0xff]  }
  0x8d   : > { %2386 = vmatpush3.bf16.msra.mxu0 %v2736_v13  ;;  %v2819_v13 = vld [vmem:[%s3166_s19 + $0x1d0] ss:$36 sps:$4 sm:$0xff]  }
  0x8e   : > { %2450 = vmatpush3.bf16.msra.mxu1 %v2737_v14  ;;  %2387 = vmatprep.subr.bf16.mxu0 %v2744_v18  ;;  %v2820_v14 = vld [vmem:[%s3166_s19 + $0xf8] ss:$36 sps:$4 sm:$0xff]   ;;  %v3328_v18 = vld [vmem:[%s262_s8] ss:$0 sm:$0xff] }
  0x8f   : > { %1353 = vmatmul.mubr.bf16.gmra.mrb[12].mxu0 %v2712_v58  ;;  %2451 = vmatprep.subr.bf16.mxu1 %v2745_v19  ;;  %v2790_v58 = vld [vmem:[%s3166_s19 + $0x130] ss:$36 sps:$4 sm:$0xff]  }
  0x90   : > { %1450 = vmatmul.mubr.bf16.gmra.mrb[12].mxu1 %v2713_v59  ;;  %1360 = vmatprep.mubr.bf16.mxu0 %v2718_v0  ;;  %v2791_v59 = vld [vmem:[%s3166_s19 + $0x138] ss:$36 sps:$4 sm:$0xff]   ;;  %v2800_v0 = vld [vmem:[%s3166_s19 + $0x1c4] ss:$36 sps:$4 sm:$0xff]  }
  0x91   : > { %1457 = vmatprep.mubr.bf16.mxu1 %v2720_v1  ;;  %2388 = vmatpush3.bf16.msra.mxu0 %v2746_v20  ;;  %v2802_v1 = vld [vmem:[%s3166_s19 + $0x1cc] ss:$36 sps:$4 sm:$0xff]  }
  0x92   : > { %2452 = vmatpush3.bf16.msra.mxu1 %v2747_v21  ;;  %2389 = vmatprep.subr.bf16.mxu0 %v2754_v26 }
  0x93   : > { %2453 = vmatprep.subr.bf16.mxu1 %v2755_v27 }
  0x95   : > { %2390 = vmatpush3.bf16.msra.mxu0 %v2756_v28 }
  0x96   : > { %2454 = vmatpush3.bf16.msra.mxu1 %v2757_v29  ;;  %2519 = vmatprep.subr.bf16.mxu0 %v2764_v32 }
  0x97   : > { %1361 = vmatmul.mubr.bf16.gmra.mrb[16].mxu0 %v2722_v2  ;;  %2551 = vmatprep.subr.bf16.mxu1 %v2764_v32  ;;  %v2804_v2 = vld [vmem:[%s3166_s19 + $0x1c0] ss:$36 sps:$4 sm:$0xff]  }
  0x98   : > { %1458 = vmatmul.mubr.bf16.gmra.mrb[16].mxu1 %v2723_v4  ;;  %1368 = vmatprep.mubr.bf16.mxu0 %v2728_v8  ;;  %v2807_v4 = vld [vmem:[%s3166_s19 + $0x20c] ss:$36 sps:$4 sm:$0xff]   ;;  %v2814_v8 = vld [vmem:[%s3166_s19 + $0x20] ss:$36 sps:$4 sm:$0xff]  }
  0x99   : > { %1465 = vmatprep.mubr.bf16.mxu1 %v2730_v9  ;;  %v2815_v9 = vld [vmem:[%s3166_s19 + $0x140] ss:$36 sps:$4 sm:$0xff]  }
  0x9f   : > { %1369 = vmatmul.mubr.bf16.gmra.mrb[20].mxu0 %v2732_v12  ;;  %v2818_v12 = vld [vmem:[%s3166_s19 + $0xb0] ss:$36 sps:$4 sm:$0xff]  }
  0xa0   : > { %1466 = vmatmul.mubr.bf16.gmra.mrb[20].mxu1 %v2733_v15  ;;  %1376 = vmatprep.mubr.bf16.mxu0 %v2738_v16  ;;  %v2821_v15 = vld [vmem:[%s3166_s19 + $0x218] ss:$36 sps:$4 sm:$0xff]   ;;  %s2886_s19 = sshll.u32 %s2976_s11, 4  ;;  %s2887_s19 = int_to_ptr.vmem [resolvable:$false] %s2886_s19 }
  0xa1   : > { %1473 = vmatprep.mubr.bf16.mxu1 %v2740_v17  ;;  %s2888_s28 = scalar_lea.vmem %s2887_s19, 2048  ;;  %p2889_p10 = scmp.lt.s32.totalorder %s3433_s21, %s2887_s19 }
  0xa2   : > { %p2890_p12 = scmp.lt.s32.totalorder %s2888_s28, %s2882_s18 }
  0xa4   : > { %p2891_p9 = por %p2890_p12, %p2889_p10 }
  0xa6   : > { %p2892_p1 = pnand %p2891_p9, %p2885_p7 }
  0xa7   : > { %1377 = vmatmul.mubr.bf16.gmra.mrb[24].mxu0 %v2742_v22 }
  0xa8   : > { %1474 = vmatmul.mubr.bf16.gmra.mrb[24].mxu1 %v2743_v23  ;;  %1384 = vmatprep.mubr.bf16.mxu0 %v2748_v24 }
  0xa9   : > { %1481 = vmatprep.mubr.bf16.mxu1 %v2750_v25 }
  0xaf   : > { %1385 = vmatmul.mubr.bf16.gmra.mrb[28].mxu0 %v2752_v30 }
  0xb0   : > { %1482 = vmatmul.mubr.bf16.gmra.mrb[28].mxu1 %v2753_v31  ;;  %1522 = vmatprep.mubr.bf16.mxu0 %v2760_v33 }
  0xb1   : > { %1619 = vmatprep.mubr.bf16.mxu1 %v2763_v34 }
  0xb7   : > { %1523 = vmatmul.mubr.bf16.vlgmr.msra.gmra.mrb[32].mxu0 %v2758_v35 }
  0xb8   : > { %1620 = vmatmul.mubr.bf16.vlgmr.msra.gmra.mrb[32].mxu1 %v2761_v36  ;;  %2520 = vmatpush3.bf16.msra.mxu0 %v2764_v32 }
  0xb9   : > { %2559 = vmatpush3.bf16.msra.mxu1 %v2764_v32  ;;  %1530 = vmatprep.mubr.bf16.mxu0 %v2765_v37 }
  0xba   : > { %1627 = vmatprep.mubr.bf16.mxu1 %v2767_v38  ;;  %2521 = vmatprep.subr.bf16.mxu0 %v2771_v39 }
  0xbb   : > { %2552 = vmatprep.subr.bf16.mxu1 %v2771_v39 }
  0xbc   : > { %2522 = vmatpush3.bf16.msra.mxu0 %v2771_v39 }
  0xbd   : > { %2560 = vmatpush3.bf16.msra.mxu1 %v2771_v39  ;;  %2523 = vmatprep.subr.bf16.mxu0 %v2778_v40 }
  0xbe   : > { %2553 = vmatprep.subr.bf16.mxu1 %v2778_v40 }
  0xbf   : > { %1531 = vmatmul.mubr.bf16.gmra.mrb[36].mxu0 %v2769_v41 }
  0xc0   : > { %1628 = vmatmul.mubr.bf16.gmra.mrb[36].mxu1 %v2770_v42  ;;  %1538 = vmatprep.mubr.bf16.mxu0 %v2772_v43 }
  0xc1   : > { %1635 = vmatprep.mubr.bf16.mxu1 %v2774_v44  ;;  %2524 = vmatpush3.bf16.msra.mxu0 %v2778_v40 }
  0xc2   : > { %2561 = vmatpush3.bf16.msra.mxu1 %v2778_v40  ;;  %2525 = vmatprep.subr.bf16.mxu0 %v2785_v45 }
  0xc3   : > { %2554 = vmatprep.subr.bf16.mxu1 %v2785_v45 }
  0xc5   : > { %2526 = vmatpush3.bf16.msra.mxu0 %v2785_v45 }
  0xc6   : > { %2562 = vmatpush3.bf16.msra.mxu1 %v2785_v45  ;;  %2527 = vmatprep.subr.bf16.mxu0 %v2792_v46 }
  0xc7   : > { %1539 = vmatmul.mubr.bf16.gmra.mrb[40].mxu0 %v2776_v47  ;;  %2555 = vmatprep.subr.bf16.mxu1 %v2792_v46 }
  0xc8   : > { %1636 = vmatmul.mubr.bf16.gmra.mrb[40].mxu1 %v2777_v48  ;;  %1546 = vmatprep.mubr.bf16.mxu0 %v2779_v49 }
  0xc9   : > { %1643 = vmatprep.mubr.bf16.mxu1 %v2781_v50  ;;  %2528 = vmatpush3.bf16.msra.mxu0 %v2792_v46 }
  0xca   : > { %2563 = vmatpush3.bf16.msra.mxu1 %v2792_v46  ;;  %2529 = vmatprep.subr.bf16.mxu0 %v2799_v51 }
  0xcb   : > { %2556 = vmatprep.subr.bf16.mxu1 %v2799_v51 }
  0xcd   : > { %2530 = vmatpush3.bf16.msra.mxu0 %v2799_v51 }
  0xce   : > { %2564 = vmatpush3.bf16.msra.mxu1 %v2799_v51  ;;  %2531 = vmatprep.subr.bf16.mxu0 %v2806_v53 }
  0xcf   : > { %1547 = vmatmul.mubr.bf16.gmra.mrb[44].mxu0 %v2783_v52  ;;  %2557 = vmatprep.subr.bf16.mxu1 %v2806_v53 }
  0xd0   : > { %1644 = vmatmul.mubr.bf16.gmra.mrb[44].mxu1 %v2784_v54  ;;  %1554 = vmatprep.mubr.bf16.mxu0 %v2786_v55 }
  0xd1   : > { %1651 = vmatprep.mubr.bf16.mxu1 %v2788_v56  ;;  %2532 = vmatpush3.bf16.msra.mxu0 %v2806_v53 }
  0xd2   : > { %2565 = vmatpush3.bf16.msra.mxu1 %v2806_v53  ;;  %2533 = vmatprep.subr.bf16.mxu0 %v2813_v57 }
  0xd3   : > { %2558 = vmatprep.subr.bf16.mxu1 %v2813_v57 }
  0xd5   : > { %2534 = vmatpush3.bf16.msra.mxu0 %v2813_v57 }
  0xd6   : > { %2566 = vmatpush3.bf16.msra.mxu1 %v2813_v57 }
  0xd7   : > { %1555 = vmatmul.mubr.bf16.gmra.mrb[48].mxu0 %v2790_v58 }
  0xd8   : > { %1652 = vmatmul.mubr.bf16.gmra.mrb[48].mxu1 %v2791_v59  ;;  %1562 = vmatprep.mubr.bf16.mxu0 %v2793_v60 }
  0xd9   : > { %1659 = vmatprep.mubr.bf16.mxu1 %v2795_v61 }
  0xdf   : > { %1563 = vmatmul.mubr.bf16.gmra.mrb[52].mxu0 %v2797_v62 }
  0xe0   : > { %1660 = vmatmul.mubr.bf16.gmra.mrb[52].mxu1 %v2798_v63  ;;  %1570 = vmatprep.mubr.bf16.mxu0 %v2800_v0 }
  0xe1   : > { %1667 = vmatprep.mubr.bf16.mxu1 %v2802_v1 }
  0xe7   : > { %1571 = vmatmul.mubr.bf16.gmra.mrb[56].mxu0 %v2804_v2 }
  0xe8   : > { %1668 = vmatmul.mubr.bf16.gmra.mrb[56].mxu1 %v2805_v3  ;;  %1578 = vmatprep.mubr.bf16.mxu0 %v2807_v4 }
  0xe9   : > { %1675 = vmatprep.mubr.bf16.mxu1 %v2809_v5 }
  0xef   : > { %1579 = vmatmul.mubr.bf16.gmra.mrb[60].mxu0 %v2811_v6 }
  0xf0   : > { %1676 = vmatmul.mubr.bf16.gmra.mrb[60].mxu1 %v2812_v7  ;;  %2535 = vmatprep.mubr.bf16.mxu0 %v2814_v8 }
  0xf1   : > { %2543 = vmatprep.mubr.bf16.mxu1 %v2815_v9 }
  0xf7   : > { %2536 = vmatmul.mubr.bf16.vlgmr.msra.gmra.mrb[64].mxu0 %v2816_v10 }
  0xf8   : > { %2544 = vmatmul.mubr.bf16.vlgmr.msra.gmra.mrb[64].mxu1 %v2817_v11  ;;  %2539 = vmatprep.mubr.bf16.mxu0 %v2818_v12 }
  0xf9   : > { %2547 = vmatprep.mubr.bf16.mxu1 %v2819_v13 }
  0xff   : > { %2540 = vmatmul.mubr.bf16.gmra.mrb[68].mxu0 %v2820_v14 }
 0x100   : > { %2548 = vmatmul.mubr.bf16.gmra.mrb[68].mxu1 %v2821_v15 }
 0x14a   : > { %v2263_v16 = vpop.f32.mrb[0].mxu0 }
 0x14b   : > { %v2327_v17 = vpop.f32.mrb[0].mxu1  ;;  %v2264_v19 = vpop.f32.mrb[1].mxu0 }
 0x14c   : > { %v2265_v20 = vadd.f32 %v2264_v19, %v2263_v16  ;;  %v2328_v21 = vpop.f32.mrb[1].mxu1  ;;  %v2266_v22 = vpop.f32.mrb[2].mxu0 }
 0x14d   : > { %v2329_v23 = vadd.f32 %v2328_v21, %v2327_v17  ;;  %v2330_v24 = vpop.f32.mrb[2].mxu1  ;;  %v2267_v25 = vpop.f32.mrb[3].mxu0 }
 0x14e   : > { %v1331_v26 = vadd.f32 %v2265_v20, %v3328_v18  ;;  %v2268_v27 = vadd.f32 %v2267_v25, %v2266_v22  ;;  %v2331_v28 = vpop.f32.mrb[3].mxu1 }
 0x14f   : > { %v2332_v29 = vadd.f32 %v2331_v28, %v2330_v24 }
 0x150   : > { %v3331_v30 = vadd.f32 %v2329_v23, %v1331_v26  ;;  %v1334_v31 = vadd.f32 %v2268_v27, %v3328_v18 }
 0x152   : > { %v3334_v32 = vadd.f32 %v2332_v29, %v1334_v31  ;;  %v2269_v33 = vpop.f32.mrb[4].mxu0 }
 0x153   : > { %v2333_v34 = vpop.f32.mrb[4].mxu1  ;;  %v2270_v35 = vpop.f32.mrb[5].mxu0 }
 0x154   : > { %v2271_v36 = vadd.f32 %v2270_v35, %v2269_v33  ;;  %v2334_v37 = vpop.f32.mrb[5].mxu1  ;;  %v2272_v38 = vpop.f32.mrb[6].mxu0 }
 0x155   : > { %v2335_v39 = vadd.f32 %v2334_v37, %v2333_v34  ;;  %v2336_v40 = vpop.f32.mrb[6].mxu1  ;;  %v2273_v41 = vpop.f32.mrb[7].mxu0 }
 0x156   : > { %v1339_v42 = vadd.f32 %v2271_v36, %v3328_v18  ;;  %v2274_v43 = vadd.f32 %v2273_v41, %v2272_v38  ;;  %v2337_v44 = vpop.f32.mrb[7].mxu1 }
 0x157   : > { %v2338_v45 = vadd.f32 %v2337_v44, %v2336_v40 }
 0x158   : > { %v3337_v46 = vadd.f32 %v2335_v39, %v1339_v42  ;;  %v1342_v47 = vadd.f32 %v2274_v43, %v3328_v18 }
 0x15a   : > { %v3340_v48 = vadd.f32 %v2338_v45, %v1342_v47  ;;  %v2275_v49 = vpop.f32.mrb[8].mxu0 }
 0x15b   : > { %v2339_v50 = vpop.f32.mrb[8].mxu1  ;;  %v2276_v51 = vpop.f32.mrb[9].mxu0 }
 0x15c   : > { %v2277_v52 = vadd.f32 %v2276_v51, %v2275_v49  ;;  %v2340_v53 = vpop.f32.mrb[9].mxu1  ;;  %v2278_v54 = vpop.f32.mrb[10].mxu0 }
 0x15d   : > { %v2341_v55 = vadd.f32 %v2340_v53, %v2339_v50  ;;  %v2342_v56 = vpop.f32.mrb[10].mxu1  ;;  %v2279_v57 = vpop.f32.mrb[11].mxu0 }
 0x15e   : > { %v1347_v58 = vadd.f32 %v2277_v52, %v3328_v18  ;;  %v2280_v59 = vadd.f32 %v2279_v57, %v2278_v54  ;;  %v2343_v60 = vpop.f32.mrb[11].mxu1 }
 0x15f   : > { %v2344_v61 = vadd.f32 %v2343_v60, %v2342_v56 }
 0x160   : > { %v3343_v62 = vadd.f32 %v2341_v55, %v1347_v58  ;;  %v1350_v63 = vadd.f32 %v2280_v59, %v3328_v18 }
 0x162   : > { %v3346_v0 = vadd.f32 %v2344_v61, %v1350_v63  ;;  %v2281_v1 = vpop.f32.mrb[12].mxu0 }
 0x163   : > { %v2345_v2 = vpop.f32.mrb[12].mxu1  ;;  %v2282_v3 = vpop.f32.mrb[13].mxu0 }
 0x164   : > { %v2283_v4 = vadd.f32 %v2282_v3, %v2281_v1  ;;  %v2346_v5 = vpop.f32.mrb[13].mxu1  ;;  %v2284_v6 = vpop.f32.mrb[14].mxu0 }
 0x165   : > { %v2347_v7 = vadd.f32 %v2346_v5, %v2345_v2  ;;  %v2348_v8 = vpop.f32.mrb[14].mxu1  ;;  %v2285_v9 = vpop.f32.mrb[15].mxu0 }
 0x166   : > { %v1355_v10 = vadd.f32 %v2283_v4, %v3328_v18  ;;  %v2286_v11 = vadd.f32 %v2285_v9, %v2284_v6  ;;  %v2349_v12 = vpop.f32.mrb[15].mxu1 }
 0x167   : > { %v2350_v13 = vadd.f32 %v2349_v12, %v2348_v8 }
 0x168   : > { %v3349_v14 = vadd.f32 %v2347_v7, %v1355_v10  ;;  %v1358_v15 = vadd.f32 %v2286_v11, %v3328_v18 }
 0x16a   : > { %v3352_v16 = vadd.f32 %v2350_v13, %v1358_v15  ;;  %v2287_v17 = vpop.f32.mrb[16].mxu0 }
 0x16b   : > { %v2351_v19 = vpop.f32.mrb[16].mxu1  ;;  %v2288_v20 = vpop.f32.mrb[17].mxu0 }
 0x16c   : > { %v2289_v21 = vadd.f32 %v2288_v20, %v2287_v17  ;;  %v2352_v22 = vpop.f32.mrb[17].mxu1  ;;  %v2290_v23 = vpop.f32.mrb[18].mxu0 }
 0x16d   : > { %v2353_v24 = vadd.f32 %v2352_v22, %v2351_v19  ;;  %v2354_v25 = vpop.f32.mrb[18].mxu1  ;;  %v2291_v26 = vpop.f32.mrb[19].mxu0 }
 0x16e   : > { %v1363_v27 = vadd.f32 %v2289_v21, %v3328_v18  ;;  %v2292_v28 = vadd.f32 %v2291_v26, %v2290_v23  ;;  %v2355_v29 = vpop.f32.mrb[19].mxu1 }
 0x16f   : > { %v2356_v31 = vadd.f32 %v2355_v29, %v2354_v25 }
 0x170   : > { %v3355_v33 = vadd.f32 %v2353_v24, %v1363_v27  ;;  %v1366_v34 = vadd.f32 %v2292_v28, %v3328_v18 }
 0x172   : > { %v3358_v35 = vadd.f32 %v2356_v31, %v1366_v34  ;;  %v2293_v36 = vpop.f32.mrb[20].mxu0 }
 0x173   : > { %v2357_v37 = vpop.f32.mrb[20].mxu1  ;;  %v2294_v38 = vpop.f32.mrb[21].mxu0 }
 0x174   : > { %v2295_v39 = vadd.f32 %v2294_v38, %v2293_v36  ;;  %v2358_v40 = vpop.f32.mrb[21].mxu1  ;;  %v2296_v41 = vpop.f32.mrb[22].mxu0 }
 0x175   : > { %v2359_v42 = vadd.f32 %v2358_v40, %v2357_v37  ;;  %v2360_v43 = vpop.f32.mrb[22].mxu1  ;;  %v2297_v44 = vpop.f32.mrb[23].mxu0 }
 0x176   : > { %v1371_v45 = vadd.f32 %v2295_v39, %v3328_v18  ;;  %v2298_v47 = vadd.f32 %v2297_v44, %v2296_v41  ;;  %v2361_v49 = vpop.f32.mrb[23].mxu1 }
 0x177   : > { %v2362_v50 = vadd.f32 %v2361_v49, %v2360_v43 }
 0x178   : > { %v3361_v51 = vadd.f32 %v2359_v42, %v1371_v45  ;;  %v1374_v52 = vadd.f32 %v2298_v47, %v3328_v18 }
 0x17a   : > { %v3364_v53 = vadd.f32 %v2362_v50, %v1374_v52  ;;  %v2299_v54 = vpop.f32.mrb[24].mxu0 }
 0x17b   : > { %v2363_v55 = vpop.f32.mrb[24].mxu1  ;;  %v2300_v56 = vpop.f32.mrb[25].mxu0 }
 0x17c   : > { %v2301_v57 = vadd.f32 %v2300_v56, %v2299_v54  ;;  %v2364_v58 = vpop.f32.mrb[25].mxu1  ;;  %v2302_v59 = vpop.f32.mrb[26].mxu0 }
 0x17d   : > { %v2365_v60 = vadd.f32 %v2364_v58, %v2363_v55  ;;  %v2366_v61 = vpop.f32.mrb[26].mxu1  ;;  %v2303_v63 = vpop.f32.mrb[27].mxu0 }
 0x17e   : > { %v1379_v1 = vadd.f32 %v2301_v57, %v3328_v18  ;;  %v2304_v2 = vadd.f32 %v2303_v63, %v2302_v59  ;;  %v2367_v3 = vpop.f32.mrb[27].mxu1 }
 0x17f   : > { %v2368_v4 = vadd.f32 %v2367_v3, %v2366_v61 }
 0x180   : > { %v3367_v5 = vadd.f32 %v2365_v60, %v1379_v1  ;;  %v1382_v6 = vadd.f32 %v2304_v2, %v3328_v18 }
 0x182   : > { %v3370_v7 = vadd.f32 %v2368_v4, %v1382_v6  ;;  %v2305_v8 = vpop.f32.mrb[28].mxu0 }
 0x183   : > { %v2369_v9 = vpop.f32.mrb[28].mxu1  ;;  %v2306_v10 = vpop.f32.mrb[29].mxu0 }
 0x184   : > { %v2307_v11 = vadd.f32 %v2306_v10, %v2305_v8  ;;  %v2370_v12 = vpop.f32.mrb[29].mxu1  ;;  %v2308_v13 = vpop.f32.mrb[30].mxu0 }
 0x185   : > { %v2371_v15 = vadd.f32 %v2370_v12, %v2369_v9  ;;  %v2372_v17 = vpop.f32.mrb[30].mxu1  ;;  %v2309_v19 = vpop.f32.mrb[31].mxu0 }
 0x186   : > { %v1387_v20 = vadd.f32 %v2307_v11, %v3328_v18  ;;  %v2310_v21 = vadd.f32 %v2309_v19, %v2308_v13  ;;  %v2373_v22 = vpop.f32.mrb[31].mxu1 }
 0x187   : > { %v2374_v23 = vadd.f32 %v2373_v22, %v2372_v17 }
 0x188   : > { %v3373_v24 = vadd.f32 %v2371_v15, %v1387_v20  ;;  %v1390_v25 = vadd.f32 %v2310_v21, %v3328_v18 }
 0x18a   : > { %v3376_v26 = vadd.f32 %v2374_v23, %v1390_v25  ;;  %v2391_v27 = vpop.f32.mrb[32].mxu0 }
 0x18b   : > { %v2455_v28 = vpop.f32.mrb[32].mxu1  ;;  %v2392_v29 = vpop.f32.mrb[33].mxu0 }
 0x18c   : > { %v2393_v31 = vadd.f32 %v2392_v29, %v2391_v27  ;;  %v2456_v34 = vpop.f32.mrb[33].mxu1  ;;  %v2394_v36 = vpop.f32.mrb[34].mxu0 }
 0x18d   : > { %v2457_v37 = vadd.f32 %v2456_v34, %v2455_v28  ;;  %v2458_v38 = vpop.f32.mrb[34].mxu1  ;;  %v2395_v39 = vpop.f32.mrb[35].mxu0 }
 0x18e   : > { %v1525_v40 = vadd.f32 %v2393_v31, %v3331_v30  ;;  %v2396_v41 = vadd.f32 %v2395_v39, %v2394_v36  ;;  %v2459_v42 = vpop.f32.mrb[35].mxu1 }
 0x18f   : > { %v2460_v43 = vadd.f32 %v2459_v42, %v2458_v38 }
 0x190   : > { %v1528_v44 = vadd.f32 %v2396_v41, %v3334_v32  ;;  %v3380_v45 = vadd.f32 %v2457_v37, %v1525_v40 }
 0x192   : > { %v2397_v18 = vpop.f32.mrb[36].mxu0  ;;  %v3382_v47 = vadd.f32 %v2460_v43, %v1528_v44 }
 0x193   : > { %v2461_v49 = vpop.f32.mrb[36].mxu1  ;;  %v2398_v50 = vpop.f32.mrb[37].mxu0 }
 0x194   : > { %v2399_v52 = vadd.f32 %v2398_v50, %v2397_v18  ;;  %v2462_v54 = vpop.f32.mrb[37].mxu1  ;;  %v2400_v55 = vpop.f32.mrb[38].mxu0 }
 0x195   : > { %v2463_v56 = vadd.f32 %v2462_v54, %v2461_v49  ;;  %v2464_v57 = vpop.f32.mrb[38].mxu1  ;;  %v2401_v58 = vpop.f32.mrb[39].mxu0 }
 0x196   : > { %v1533_v30 = vadd.f32 %v2399_v52, %v3337_v46  ;;  %v2402_v59 = vadd.f32 %v2401_v58, %v2400_v55  ;;  %v2465_v60 = vpop.f32.mrb[39].mxu1 }
 0x197   : > { %v2466_v61 = vadd.f32 %v2465_v60, %v2464_v57 }
 0x198   : > { %v1536_v32 = vadd.f32 %v2402_v59, %v3340_v48  ;;  %v3386_v63 = vadd.f32 %v2463_v56, %v1533_v30 }
 0x19a   : > { %v2403_v1 = vpop.f32.mrb[40].mxu0  ;;  %v3388_v2 = vadd.f32 %v2466_v61, %v1536_v32 }
 0x19b   : > { %v2467_v3 = vpop.f32.mrb[40].mxu1  ;;  %v2404_v4 = vpop.f32.mrb[41].mxu0 }
 0x19c   : > { %v2405_v6 = vadd.f32 %v2404_v4, %v2403_v1  ;;  %v2468_v8 = vpop.f32.mrb[41].mxu1  ;;  %v2406_v9 = vpop.f32.mrb[42].mxu0 }
 0x19d   : > { %v2469_v10 = vadd.f32 %v2468_v8, %v2467_v3  ;;  %v2470_v11 = vpop.f32.mrb[42].mxu1  ;;  %v2407_v12 = vpop.f32.mrb[43].mxu0 }
 0x19e   : > { %v1541_v46 = vadd.f32 %v2405_v6, %v3343_v62  ;;  %v2408_v13 = vadd.f32 %v2407_v12, %v2406_v9  ;;  %v2471_v15 = vpop.f32.mrb[43].mxu1 }
 0x19f   : > { %v2472_v17 = vadd.f32 %v2471_v15, %v2470_v11 }
 0x1a0   : > { %v1544_v48 = vadd.f32 %v2408_v13, %v3346_v0  ;;  %v3392_v19 = vadd.f32 %v2469_v10, %v1541_v46 }
 0x1a2   : > { %v2409_v20 = vpop.f32.mrb[44].mxu0  ;;  %v3394_v21 = vadd.f32 %v2472_v17, %v1544_v48 }
 0x1a3   : > { %v2473_v22 = vpop.f32.mrb[44].mxu1  ;;  %v2410_v23 = vpop.f32.mrb[45].mxu0 }
 0x1a4   : > { %v2411_v25 = vadd.f32 %v2410_v23, %v2409_v20  ;;  %v2474_v27 = vpop.f32.mrb[45].mxu1  ;;  %v2412_v28 = vpop.f32.mrb[46].mxu0 }
 0x1a5   : > { %v2475_v29 = vadd.f32 %v2474_v27, %v2473_v22  ;;  %v2476_v31 = vpop.f32.mrb[46].mxu1  ;;  %v2413_v34 = vpop.f32.mrb[47].mxu0 }
 0x1a6   : > { %v1549_v62 = vadd.f32 %v2411_v25, %v3349_v14  ;;  %v2414_v36 = vadd.f32 %v2413_v34, %v2412_v28  ;;  %v2477_v37 = vpop.f32.mrb[47].mxu1 }
 0x1a7   : > { %v2478_v38 = vadd.f32 %v2477_v37, %v2476_v31 }
 0x1a8   : > { %v1552_v0 = vadd.f32 %v2414_v36, %v3352_v16  ;;  %v3398_v39 = vadd.f32 %v2475_v29, %v1549_v62 }
 0x1aa   : > { %v2415_v40 = vpop.f32.mrb[48].mxu0  ;;  %v3400_v41 = vadd.f32 %v2478_v38, %v1552_v0 }
 0x1ab   : > { %v2479_v42 = vpop.f32.mrb[48].mxu1  ;;  %v2416_v43 = vpop.f32.mrb[49].mxu0 }
 0x1ac   : > { %v2417_v44 = vadd.f32 %v2416_v43, %v2415_v40  ;;  %v2480_v18 = vpop.f32.mrb[49].mxu1  ;;  %v2418_v49 = vpop.f32.mrb[50].mxu0 }
 0x1ad   : > { %v2481_v50 = vadd.f32 %v2480_v18, %v2479_v42  ;;  %v2482_v52 = vpop.f32.mrb[50].mxu1  ;;  %v2419_v54 = vpop.f32.mrb[51].mxu0 }
 0x1ae   : > { %v1557_v14 = vadd.f32 %v2417_v44, %v3355_v33  ;;  %v2420_v55 = vadd.f32 %v2419_v54, %v2418_v49  ;;  %v2483_v56 = vpop.f32.mrb[51].mxu1 }
 0x1af   : > { %v2484_v57 = vadd.f32 %v2483_v56, %v2482_v52 }
 0x1b0   : > { %v1560_v16 = vadd.f32 %v2420_v55, %v3358_v35  ;;  %v1654_v58 = vadd.f32 %v2481_v50, %v1557_v14 }
 0x1b2   : > { %v2421_v30 = vpop.f32.mrb[52].mxu0  ;;  %v3404_v59 = vadd.f32 %v2484_v57, %v1560_v16 }
 0x1b3   : > { %v2485_v60 = vpop.f32.mrb[52].mxu1  ;;  %v2422_v61 = vpop.f32.mrb[53].mxu0 }
 0x1b4   : > { %v2423_v32 = vadd.f32 %v2422_v61, %v2421_v30  ;;  %v2486_v1 = vpop.f32.mrb[53].mxu1  ;;  %v2424_v3 = vpop.f32.mrb[54].mxu0 }
 0x1b5   : > { %v2487_v4 = vadd.f32 %v2486_v1, %v2485_v60  ;;  %v2488_v6 = vpop.f32.mrb[54].mxu1  ;;  %v2425_v8 = vpop.f32.mrb[55].mxu0 }
 0x1b6   : > { %v1565_v9 = vadd.f32 %v2423_v32, %v3361_v51  ;;  %v2426_v33 = vadd.f32 %v2425_v8, %v2424_v3  ;;  %v2489_v10 = vpop.f32.mrb[55].mxu1 }
 0x1b7   : > { %v2490_v11 = vadd.f32 %v2489_v10, %v2488_v6 }
 0x1b8   : > { %v1568_v12 = vadd.f32 %v2426_v33, %v3364_v53  ;;  %v1662_v35 = vadd.f32 %v2487_v4, %v1565_v9 }
 0x1ba   : > { %v2427_v46 = vpop.f32.mrb[56].mxu0  ;;  %v1665_v13 = vadd.f32 %v2490_v11, %v1568_v12 }
 0x1bb   : > { %v2491_v15 = vpop.f32.mrb[56].mxu1  ;;  %v2428_v17 = vpop.f32.mrb[57].mxu0 }
 0x1bc   : > { %v2429_v48 = vadd.f32 %v2428_v17, %v2427_v46  ;;  %v2492_v20 = vpop.f32.mrb[57].mxu1  ;;  %v2430_v22 = vpop.f32.mrb[58].mxu0 }
 0x1bd   : > { %v2493_v23 = vadd.f32 %v2492_v20, %v2491_v15  ;;  %v2494_v25 = vpop.f32.mrb[58].mxu1  ;;  %v2431_v27 = vpop.f32.mrb[59].mxu0 }
 0x1be   : > { %v1573_v28 = vadd.f32 %v2429_v48, %v3367_v5  ;;  %v2432_v29 = vadd.f32 %v2431_v27, %v2430_v22  ;;  %v2495_v51 = vpop.f32.mrb[59].mxu1 }
 0x1bf   : > { %v2496_v31 = vadd.f32 %v2495_v51, %v2494_v25 }
 0x1c0   : > { %v1576_v34 = vadd.f32 %v2432_v29, %v3370_v7  ;;  %v1670_v62 = vadd.f32 %v2493_v23, %v1573_v28 }
 0x1c2   : > { %v2433_v53 = vpop.f32.mrb[60].mxu0  ;;  %v3410_v36 = vadd.f32 %v2496_v31, %v1576_v34 }
 0x1c3   : > { %v2497_v37 = vpop.f32.mrb[60].mxu1  ;;  %v2434_v38 = vpop.f32.mrb[61].mxu0 }
 0x1c4   : > { %v2435_v0 = vadd.f32 %v2434_v38, %v2433_v53  ;;  %v2498_v40 = vpop.f32.mrb[61].mxu1  ;;  %v2436_v42 = vpop.f32.mrb[62].mxu0 }
 0x1c5   : > { %v2499_v43 = vadd.f32 %v2498_v40, %v2497_v37  ;;  %v2500_v44 = vpop.f32.mrb[62].mxu1  ;;  %v2437_v18 = vpop.f32.mrb[63].mxu0 }
 0x1c6   : > { %v1581_v49 = vadd.f32 %v2435_v0, %v3373_v24  ;;  %v2438_v5 = vadd.f32 %v2437_v18, %v2436_v42  ;;  %v2501_v50 = vpop.f32.mrb[63].mxu1 }
 0x1c7   : > { %v2502_v52 = vadd.f32 %v2501_v50, %v2500_v44 }
 0x1c8   : > { %v1584_v7 = vadd.f32 %v2438_v5, %v3376_v26  ;;  %v1678_v54 = vadd.f32 %v2499_v43, %v1581_v49 }
 0x1ca   : > { %v2537_v14 = vpop.f32.mrb[64].mxu0  ;;  %v1681_v55 = vadd.f32 %v2502_v52, %v1584_v7 }
 0x1cb   : > { %v1727_v56 = vadd.f32 %v2537_v14, %v3386_v63  ;;  %v2545_v57 = vpop.f32.mrb[64].mxu1  ;;  %v1718_v16 = vpop.f32.mrb[65].mxu0 }
 0x1cc   : > { %v1759_v30 = vadd.f32 %v2545_v57, %v1662_v35  ;;  %v1719_v60 = vadd.f32 %v1718_v16, %v3380_v45  ;;  %v1750_v61 = vpop.f32.mrb[65].mxu1  ;;  %v2538_v32 = vpop.f32.mrb[66].mxu0 }
 0x1cd   : > { %v1751_v1 = vadd.f32 %v1750_v61, %v1654_v58  ;;  %v1730_v24 = vadd.f32 %v2538_v32, %v3388_v2  ;;  %v2546_v3 = vpop.f32.mrb[66].mxu1  ;;  %v1721_v4 = vpop.f32.mrb[67].mxu0  ;;  %v1783_v9 = vmax.f32 %v1727_v56, 0.0 }
 0x1ce   : > { %v1762_v6 = vadd.f32 %v2546_v3, %v1665_v13  ;;  %v1722_v26 = vadd.f32 %v1721_v4, %v3382_v47  ;;  %v1753_v8 = vpop.f32.mrb[67].mxu1  ;;  %v1791_v10 = vmax.f32 %v1759_v30, 0.0  ;;  %v1781_v11 = vmax.f32 %v1719_v60, 0.0 }
 0x1cf   : > { %v1784_v33 = vmax.f32 %v1730_v24, 0.0  ;;  %v1754_v63 = vadd.f32 %v1753_v8, %v3404_v59  ;;  %v1789_v35 = vmax.f32 %v1751_v1, 0.0 }
 0x1d0   : > { %v1792_v12 = vmax.f32 %v1762_v6, 0.0  ;;  %v1782_v45 = vmax.f32 %v1722_v26, 0.0 }
 0x1d1   : > { %v2208_v46 = vpack.c.bf16 %v1784_v33, %v1783_v9  ;;  %v1790_v58 = vmax.f32 %v1754_v63, 0.0 }
 0x1d2   : > { %v2228_v15 = vpack.c.bf16 %v1792_v12, %v1791_v10  ;;  %v2203_v17 = vpack.c.bf16 %v1782_v45, %v1781_v11  ;;  %v2541_v2 = vpop.f32.mrb[68].mxu0 }
 0x1d3   : > { %2240 = vst [vmem:[%s3420_s29 + $0x8] sm:$0xff] %v2208_v46   ;;  %v2223_v47 = vpack.c.bf16 %v1790_v58, %v1789_v35  ;;  %v1743_v59 = vadd.f32 %v2541_v2, %v3398_v39  ;;  %v2549_v13 = vpop.f32.mrb[68].mxu1  ;;  %v1734_v48 = vpop.f32.mrb[69].mxu0 }
 0x1d4   : > { %2244 = vst [vmem:[%s3420_s29 + $0x28] sm:$0xff] %v2228_v15   ;;  %2204 = vst [vmem:[%s3420_s29] sm:$0xff] %v2203_v17   ;;  %v1775_v20 = vadd.f32 %v2549_v13, %v1678_v54  ;;  %v1735_v22 = vadd.f32 %v1734_v48, %v3392_v19  ;;  %v1766_v23 = vpop.f32.mrb[69].mxu1  ;;  %v2542_v25 = vpop.f32.mrb[70].mxu0 }
 0x1d5   : > { %2243 = vst [vmem:[%s3420_s29 + $0x20] sm:$0xff] %v2223_v47   ;;  %v1767_v27 = vadd.f32 %v1766_v23, %v1670_v62  ;;  %v1746_v28 = vadd.f32 %v2542_v25, %v3400_v41  ;;  %v2550_v29 = vpop.f32.mrb[70].mxu1  ;;  %v1737_v51 = vpop.f32.mrb[71].mxu0  ;;  %v1787_v53 = vmax.f32 %v1743_v59, 0.0 }
 0x1d6   : > { %v1778_v31 = vadd.f32 %v2550_v29, %v1681_v55  ;;  %v1738_v39 = vadd.f32 %v1737_v51, %v3394_v21  ;;  %v1769_v34 = vpop.f32.mrb[71].mxu1  ;;  %v1795_v19 = vmax.f32 %v1775_v20, 0.0  ;;  %v1785_v62 = vmax.f32 %v1735_v22, 0.0 }
 0x1d7   : > { %v1788_v37 = vmax.f32 %v1746_v28, 0.0  ;;  %v1770_v38 = vadd.f32 %v1769_v34, %v3410_v36  ;;  %v1793_v21 = vmax.f32 %v1767_v27, 0.0 }
 0x1d8   : > { %v1796_v41 = vmax.f32 %v1778_v31, 0.0  ;;  %v1786_v0 = vmax.f32 %v1738_v39, 0.0 }
 0x1d9   : > { %v2218_v40 = vpack.c.bf16 %v1788_v37, %v1787_v53  ;;  %v1794_v42 = vmax.f32 %v1770_v38, 0.0 }
 0x1da   : > { %v2238_v43 = vpack.c.bf16 %v1796_v41, %v1795_v19  ;;  %v2213_v44 = vpack.c.bf16 %v1786_v0, %v1785_v62 }
 0x1db   : > { %2242 = vst [vmem:[%s3420_s29 + $0x18] sm:$0xff] %v2218_v40   ;;  %v2233_v36 = vpack.c.bf16 %v1794_v42, %v1793_v21 }
 0x1dc   : > { %2246 = vst [vmem:[%s3420_s29 + $0x38] sm:$0xff] %v2238_v43   ;;  %2241 = vst [vmem:[%s3420_s29 + $0x10] sm:$0xff] %v2213_v44  }
 0x1dd   : > { %2245 = vst [vmem:[%s3420_s29 + $0x30] sm:$0xff] %v2233_v36  }
 0x1de   : > { %2895 = shalt.err (!%p2892_p1)
}
 0x1df   : > { %s2896_s4 = scalar_lea.hbm %s3438_s15, 1024  ;;  %s2900_s5 = scalar_lea.hbm %s3494_s3, 2048 }
 0x1e0   : > { %p2897_p5 = scmp.ne.s32.totalorder %s3438_s15, %s2896_s4  ;;  %p2901_p6 = scmp.lt.u32.totalorder %s3438_s15, %s3494_s3 }
 0x1e1   : > { %p2902_p8 = scmp.lt.u32.totalorder %s2900_s5, %s2896_s4  ;;  %p2904_p3 = scmp.lt.u32.totalorder %s2896_s4, %s3438_s15 }
 0x1e2   : > { %p2898_p2 = pnand %p2897_p5, %p3505_p11 }
 0x1e3   : > { %p2903_p0 = por %p2902_p8, %p2901_p6 }
 0x1e4   : > { %p2899_p4 = pneg %p2898_p2 }
 0x1e5   : > { %p2905_p13 = por %p2904_p3, %p2903_p0 }
 0x1e7   : > { %p2906_p7 = pnand %p2905_p13, %p2899_p4 }
 0x1e9   : > { %2909 = shalt.err (!%p2906_p7)
}
 0x1ea   : > { %s2977_s29 = smov 64   ;;  %s2978_s22 = smov 128  }
 0x1eb   : > { %s2979_s6 = smov 4  }
 0x1ec   : > { %2576 = dma.vmem_to_hbm [thread:$0]  (%p3505_p11), %s3433_s21, 1024, %s3438_s15, %s1878_s30, %s2977_s29, %s2978_s22, %s2979_s6  }
 0x1ed PF: > { %s1908_s9 = sand.u32 1, %s2948_s12   ;;  %p3506_p10 = scmp.ne.s32.totalorder %s3500_s27, 0 }
 0x1ee   : > { %p3507_p12 = scmp.ge.s32.totalorder %s2968_s17, 2  ;;  %s1909_s18 = scalar_lea.sflag [#allocation4], %s1908_s9 }
 0x1f0   : > { %p2586_p9 = pnand %p3507_p12, %p3506_p10 }
 0x1f2   : > { %2943 = dma.done.wait (!%p2586_p9), %s1909_s18, 1024  }
 0x1f3   : > { %2945 = vsyncadd (!%p2586_p9), %s1909_s18, 4294966272  ;;  %s22_s17 = sadd.s32 1, %s2968_s17   ;;  %s3508_s12 = smov %s2952_s13 }
 0x1f4   : > { %p19_p1 = scmp.ge.s32.totalorder %s22_s17, 4   ;;  %s3509_s13 = smov %s2956_s14 }
 0x1f5   : > { %s3510_s14 = smov %s3056_s26  ;;  %s3511_s15 = smov %s2964_s16 }
 0x1f6   : > { %s3512_s16 = smov %s3514_s20  ;;  %21 = sbr.rel (!%p19_p1) target bundleno = 8 (0x8), region = 93 }
 0x1fd   :  { %1914 = vsyncpa [#allocation3], 1 }
 0x1fe   :  { %1916 = vsyncpa [#allocation3 + $0x1], 1 }
 0x1ff   :  { %1917 = vsyncpa [#allocation6], 1 }
 0x200   :  { %1919 = vsyncpa [#allocation6 + $0x1], 1 }
 0x201   :  { %1920 = vsyncpa [#allocation4], 1 }
 0x202   :  { %1922 = vsyncpa [#allocation4 + $0x1], 1 }

</bundles_post_ra>
